<compile_context>
chip_gen: v6e
topology: v6e:2x2x1
jax: 0.10.0
libtpu: 0.0.40
codegen_flags: <defaults>
</compile_context>

<pallas_src>
import jax
import jax.numpy as jnp
import numpy as np
from jax.experimental import pallas as pl
from jax.experimental.pallas import tpu as pltpu  # noqa: F401  (TPU backend)

C = 336          # channels fixed by the module definition
EPS = 1e-5


def _fused_kernel(x_ref, res_ref, w_ref, vec_ref, o_ref):
    """BN1(x) + residual -> ReLU -> (BN2-scale-folded W) @ act -> + BN2 shift.

    x_ref, res_ref : (C, HW)  activations, channel on sublanes, pixels on lanes
    w_ref          : (Cout, Cin) 1x1-conv weight with BN2 scale pre-folded
    vec_ref        : (3*C, 1) packed per-channel vectors [s1; sh1; sh2]
    o_ref          : (Cout, HW)
    """
    # Static Ref slices -> zero-cost views of the packed per-channel vectors.
    s1 = vec_ref[0:C, :]                 # (C, 1)  bn1 scale
    sh1 = vec_ref[C:2 * C, :]            # (C, 1)  bn1 shift
    sh2 = vec_ref[2 * C:3 * C, :]        # (C, 1)  bn2 shift

    # BN1 (eval) + residual add + ReLU, per-channel broadcast along lanes (VPU).
    act = jnp.maximum(res_ref[...] + x_ref[...] * s1 + sh1, 0.0)   # (C, HW)

    # 1x1 conv as MXU matmul: (Cout, Cin) @ (Cin, HW) -> (Cout, HW)
    y = jnp.dot(w_ref[...], act, preferred_element_type=jnp.float32)

    # BN2 shift (scale already folded into the weight).
    o_ref[...] = y + sh2


def fold_params(params):
    """One-time folding of BN stats into per-channel scale/shift + conv weight."""
    (g1, b1, rm1, rv1, w, g2, b2, rm2, rv2) = params

    # Fold BN running stats (eval semantics) into per-channel scale/shift.
    s1 = g1 * jax.lax.rsqrt(rv1 + EPS)
    sh1 = b1 - rm1 * s1
    s2 = g2 * jax.lax.rsqrt(rv2 + EPS)
    sh2 = b2 - rm2 * s2

    # Fold BN2 scale into the conv weight rows: (s2*W) @ act == s2 * (W @ act).
    wf = w[:, :, 0, 0] * s2[:, None]                     # (Cout, Cin)

    # Pack remaining per-channel vectors into one input -> one small DMA.
    vec = jnp.concatenate([s1, sh1, sh2]).reshape(3 * C, 1)
    return wf, vec


@jax.jit
def fused_forward(x198, x185, wf, vec):
    """x198, x185: (1, C, H, W) f32; wf: (C, C); vec: (3C, 1). Returns NCHW f32."""
    N, Cc, H, W = x198.shape
    HW = H * W

    # NCHW -> (C, HW): pure reshape (no data movement), unlike NHWC transpose.
    xf = x198.reshape(Cc, HW)
    rf = x185.reshape(Cc, HW)

    out2d = pl.pallas_call(
        _fused_kernel,
        out_shape=jax.ShapeDtypeStruct((Cc, HW), jnp.float32),
        in_specs=[
            pl.BlockSpec((Cc, HW), lambda: (0, 0)),       # x198 as (C, HW)
            pl.BlockSpec((Cc, HW), lambda: (0, 0)),       # x185 as (C, HW)
            pl.BlockSpec((Cc, Cc), lambda: (0, 0)),       # folded conv weight
            pl.BlockSpec((3 * Cc, 1), lambda: (0, 0)),    # packed BN vectors
        ],
        out_specs=pl.BlockSpec((Cc, HW), lambda: (0, 0)),
    )(xf, rf, wf, vec)

    # (C, HW) -> NCHW: pure reshape, no transpose.
    return out2d.reshape(N, Cc, H, W)


def fused_bn_add_relu_conv_bn(x198, x185, params):
    wf, vec = fold_params(params)
    return fused_forward(x198, x185, wf, vec)


def init_params(key):
    ks = jax.random.split(key, 9)
    g1 = jax.random.normal(ks[0], (C,), jnp.float32) * 0.1 + 1.0
    b1 = jax.random.normal(ks[1], (C,), jnp.float32) * 0.1
    rm1 = jax.random.normal(ks[2], (C,), jnp.float32) * 0.1
    rv1 = jax.random.uniform(ks[3], (C,), jnp.float32, 0.5, 1.5)
    w = jax.random.normal(ks[4], (C, C, 1, 1), jnp.float32) * 0.05
    g2 = jax.random.normal(ks[5], (C,), jnp.float32) * 0.1 + 1.0
    b2 = jax.random.normal(ks[6], (C,), jnp.float32) * 0.1
    rm2 = jax.random.normal(ks[7], (C,), jnp.float32) * 0.1
    rv2 = jax.random.uniform(ks[8], (C,), jnp.float32, 0.5, 1.5)
    return (g1, b1, rm1, rv1, w, g2, b2, rm2, rv2)


def reference(x198, x185, params):
    """Pure-JAX reference of the PyTorch forward (eval-mode BN)."""
    (g1, b1, rm1, rv1, w, g2, b2, rm2, rv2) = params
    bn1 = (x198 - rm1[None, :, None, None]) / jnp.sqrt(rv1 + EPS)[None, :, None, None]
    bn1 = bn1 * g1[None, :, None, None] + b1[None, :, None, None]
    act = jnp.maximum(x185 + bn1, 0.0)
    # 1x1 conv, no bias
    y = jnp.einsum("nchw,oc->nohw", act, w[:, :, 0, 0])
    bn2 = (y - rm2[None, :, None, None]) / jnp.sqrt(rv2 + EPS)[None, :, None, None]
    return bn2 * g2[None, :, None, None] + b2[None, :, None, None]


if __name__ == "__main__":
    key = jax.random.PRNGKey(0)
    k1, k2, kp = jax.random.split(key, 3)

    # shapes match the module: (1, 336, 14, 14)
    x198 = jax.random.normal(k1, (1, C, 14, 14), jnp.float32)
    x185 = jax.random.normal(k2, (1, C, 14, 14), jnp.float32)
    params = init_params(kp)

    out = fused_bn_add_relu_conv_bn(x198, x185, params)
    out = jax.block_until_ready(out)

    ref = jax.block_until_ready(reference(x198, x185, params))
    assert out.shape == (1, C, 14, 14)
    np.testing.assert_allclose(np.asarray(out), np.asarray(ref), rtol=1e-4, atol=1e-4)

    print("KERNEL_OK")
</pallas_src>

<mosaic_0001>
module attributes {stable_mosaic.version = 11 : i64} {
  func.func @_fused_kernel(%arg0: memref<336x196xf32, #tpu.memory_space<vmem>>, %arg1: memref<336x196xf32, #tpu.memory_space<vmem>>, %arg2: memref<336x336xf32, #tpu.memory_space<vmem>>, %arg3: memref<1008x1xf32, #tpu.memory_space<vmem>>, %arg4: memref<336x196xf32, #tpu.memory_space<vmem>>) attributes {dimension_semantics = [], scalar_prefetch = 0 : i64, scratch_operands = 0 : i64, tpu.core_type = #tpu.core_type<tc>} {
    %c0 = arith.constant 0 : index
    %c0_0 = arith.constant 0 : index
    %0 = vector.load %arg3[%c0, %c0_0] : memref<1008x1xf32, #tpu.memory_space<vmem>>, vector<336x1xf32>
    %c336 = arith.constant 336 : index
    %c0_1 = arith.constant 0 : index
    %1 = vector.load %arg3[%c336, %c0_1] : memref<1008x1xf32, #tpu.memory_space<vmem>>, vector<336x1xf32>
    %c672 = arith.constant 672 : index
    %c0_2 = arith.constant 0 : index
    %2 = vector.load %arg3[%c672, %c0_2] : memref<1008x1xf32, #tpu.memory_space<vmem>>, vector<336x1xf32>
    %c0_3 = arith.constant 0 : index
    %c0_4 = arith.constant 0 : index
    %3 = vector.load %arg1[%c0_3, %c0_4] : memref<336x196xf32, #tpu.memory_space<vmem>>, vector<336x196xf32>
    %c0_5 = arith.constant 0 : index
    %c0_6 = arith.constant 0 : index
    %4 = vector.load %arg0[%c0_5, %c0_6] : memref<336x196xf32, #tpu.memory_space<vmem>>, vector<336x196xf32>
    %5 = vector.broadcast %0 : vector<336x1xf32> to vector<336x196xf32>
    %6 = arith.mulf %4, %5 : vector<336x196xf32>
    %7 = arith.addf %3, %6 : vector<336x196xf32>
    %8 = vector.broadcast %1 : vector<336x1xf32> to vector<336x196xf32>
    %9 = arith.addf %7, %8 : vector<336x196xf32>
    %cst = arith.constant 0.000000e+00 : f32
    %10 = vector.broadcast %cst : f32 to vector<336x196xf32>
    %11 = arith.maximumf %9, %10 : vector<336x196xf32>
    %c0_7 = arith.constant 0 : index
    %c0_8 = arith.constant 0 : index
    %12 = vector.load %arg2[%c0_7, %c0_8] : memref<336x336xf32, #tpu.memory_space<vmem>>, vector<336x336xf32>
    %cst_9 = arith.constant dense<0.000000e+00> : vector<336x196xf32>
    %13 = tpu.matmul %12, %11, %cst_9 {dimension_numbers = #tpu.dot_dimension_numbers<[1], [0], [0], [1], [0, 0, 1, 1], [], []>} : vector<336x336xf32>, vector<336x196xf32>, vector<336x196xf32> -> vector<336x196xf32>
    %14 = vector.broadcast %2 : vector<336x1xf32> to vector<336x196xf32>
    %15 = arith.addf %13, %14 : vector<336x196xf32>
    %c0_10 = arith.constant 0 : index
    %c0_11 = arith.constant 0 : index
    %16 = vector.load %arg4[%c0_10, %c0_11] : memref<336x196xf32, #tpu.memory_space<vmem>>, vector<336x196xf32>
    tpu.vector_store %arg4[%c0_10, %c0_11], %15 {strides = array<i32>} : memref<336x196xf32, #tpu.memory_space<vmem>>, vector<336x196xf32>,
    return
  }
}

</mosaic_0001>

<bundles_post_ra>
// kernel: fused_forward.1
= control target key start
LH: loop header
LB: loop body
LE: loop exit
PB: predicated region body
PF: predicated region fallthrough
CT: control target
= control target key end

     0   :  { %v2299_v0 = vmov 0   ;;  %vm1403_vm0 = vcmask 654336   ;;  %vm2165_vm1 = vcmask 556032   ;;  %s4000_s3 = inlined_call_operand.vmem [shape: f32[1008,1], index: 3, kind: input, shape index: {}]   ;;  %s4001_s0 = inlined_call_operand.vmem [shape: f32[336,196], index: 0, kind: input, shape index: {}]   ;;  %s4002_s1 = inlined_call_operand.vmem [shape: f32[336,196], index: 1, kind: input, shape index: {}]   ;;  %s4003_s2 = inlined_call_operand.vmem [shape: f32[336,336], index: 2, kind: input, shape index: {}]   ;;  %s4004_s4 = inlined_call_operand.vmem [shape: f32[336,196], index: 4, kind: output, shape index: {}]  }
   0x1   :  { %2298 = vset.pattern.permute.xlu1 %v2299_v0  ;;  %2297 = vset.pattern.permute.xlu0 %v2299_v0  ;;  %v32_v1 = vld [vmem:[%s4000_s3 + $0x78] sm:$0xff]  ;;  %v17_v2 = vld [vmem:[%s4000_s3] sm:$0xff]  ;;  %v31_v3 = vld [vmem:[%s4000_s3 + $0x70] sm:$0xff] }
   0x2   :  { %388 = vperm.xlu1 %2298, %v32_v1   ;;  %313 = vperm.xlu0 %2297, %v17_v2   ;;  %v18_v4 = vld [vmem:[%s4000_s3 + $0x8] sm:$0xff]  ;;  %v73_v7 = vld [vmem:[%s4000_s3 + $0x1c0] sm:$0xff]  ;;  %v72_v9 = vld [vmem:[%s4000_s3 + $0x1b8] sm:$0xff] }
   0x3   :  { %v74_v5 = vld [vmem:[%s4000_s3 + $0x1c8] sm:$0xff]  ;;  %v29_v8 = vld [vmem:[%s4000_s3 + $0x60] sm:$0xff]  ;;  %v28_v10 = vld [vmem:[%s4000_s3 + $0x58] sm:$0xff] }
   0x4   :  { %v30_v6 = vld [vmem:[%s4000_s3 + $0x68] sm:$0xff]  ;;  %v71_v11 = vld [vmem:[%s4000_s3 + $0x1b0] sm:$0xff]  ;;  %v69_v15 = vld [vmem:[%s4000_s3 + $0x1a0] sm:$0xff] }
   0x5   :  { %v27_v12 = vld [vmem:[%s4000_s3 + $0x50] sm:$0xff]  ;;  %v70_v13 = vld [vmem:[%s4000_s3 + $0x1a8] sm:$0xff]  ;;  %v25_v16 = vld [vmem:[%s4000_s3 + $0x40] sm:$0xff] }
   0x6   :  { %383 = vperm.xlu1 %2298, %v31_v3   ;;  %318 = vperm.xlu0 %2297, %v18_v4   ;;  %v26_v14 = vld [vmem:[%s4000_s3 + $0x48] sm:$0xff]  ;;  %v68_v17 = vld [vmem:[%s4000_s3 + $0x198] sm:$0xff]  ;;  %v67_v19 = vld [vmem:[%s4000_s3 + $0x190] sm:$0xff] }
   0x7   :  { %v24_v18 = vld [vmem:[%s4000_s3 + $0x38] sm:$0xff]  ;;  %v23_v20 = vld [vmem:[%s4000_s3 + $0x30] sm:$0xff]  ;;  %v66_v21 = vld [vmem:[%s4000_s3 + $0x188] sm:$0xff] }
   0x8   :  { %v22_v22 = vld [vmem:[%s4000_s3 + $0x28] sm:$0xff]  ;;  %v65_v23 = vld [vmem:[%s4000_s3 + $0x180] sm:$0xff]  ;;  %v64_v25 = vld [vmem:[%s4000_s3 + $0x178] sm:$0xff] }
   0x9   :  { %v21_v24 = vld [vmem:[%s4000_s3 + $0x20] sm:$0xff]  ;;  %v20_v26 = vld [vmem:[%s4000_s3 + $0x18] sm:$0xff]  ;;  %v63_v27 = vld [vmem:[%s4000_s3 + $0x170] sm:$0xff] }
   0xa   :  { %766 = vperm.xlu1 %2298, %v74_v5   ;;  %378 = vperm.xlu0 %2297, %v30_v6   ;;  %v19_v28 = vld [vmem:[%s4000_s3 + $0x10] sm:$0xff]  ;;  %v61_v29 = vld [vmem:[%s4000_s3 + $0x160] sm:$0xff]  ;;  %v62_v30 = vld [vmem:[%s4000_s3 + $0x168] sm:$0xff] }
   0xb   :  { %v60_v31 = vld [vmem:[%s4000_s3 + $0x158] sm:$0xff]  ;;  %v59_v33 = vld [vmem:[%s4000_s3 + $0x150] sm:$0xff]  ;;  %v90_v35 = vld [vmem:[%s4000_s3 + $0x248] sm:$0xff] }
   0xc   :  { %v48_v32 = vld [vmem:[%s4000_s3 + $0xf8] sm:$0xff]  ;;  %v47_v34 = vld [vmem:[%s4000_s3 + $0xf0] sm:$0xff]  ;;  %v46_v36 = vld [vmem:[%s4000_s3 + $0xe8] sm:$0xff] }
   0xd   :  { %v89_v37 = vld [vmem:[%s4000_s3 + $0x240] sm:$0xff]  ;;  %v88_v39 = vld [vmem:[%s4000_s3 + $0x238] sm:$0xff]  ;;  %v87_v41 = vld [vmem:[%s4000_s3 + $0x230] sm:$0xff] }
   0xe   :  { %761 = vperm.xlu1 %2298, %v73_v7   ;;  %373 = vperm.xlu0 %2297, %v29_v8   ;;  %v45_v38 = vld [vmem:[%s4000_s3 + $0xe0] sm:$0xff]  ;;  %v44_v40 = vld [vmem:[%s4000_s3 + $0xd8] sm:$0xff]  ;;  %v43_v42 = vld [vmem:[%s4000_s3 + $0xd0] sm:$0xff] }
   0xf   :  { %v86_v43 = vld [vmem:[%s4000_s3 + $0x228] sm:$0xff]  ;;  %v41_v46 = vld [vmem:[%s4000_s3 + $0xc0] sm:$0xff]  ;;  %v40_v47 = vld [vmem:[%s4000_s3 + $0xb8] sm:$0xff] }
  0x10   :  { %v42_v44 = vld [vmem:[%s4000_s3 + $0xc8] sm:$0xff]  ;;  %v85_v48 = vld [vmem:[%s4000_s3 + $0x220] sm:$0xff]  ;;  %v84_v49 = vld [vmem:[%s4000_s3 + $0x218] sm:$0xff] }
  0x11   :  { %v58_v45 = vld [vmem:[%s4000_s3 + $0x148] sm:$0xff]  ;;  %v57_v50 = vld [vmem:[%s4000_s3 + $0x140] sm:$0xff]  ;;  %v56_v51 = vld [vmem:[%s4000_s3 + $0x138] sm:$0xff] }
  0x12   :  { %756 = vperm.xlu1 %2298, %v72_v9   ;;  %368 = vperm.xlu0 %2297, %v28_v10   ;;  %v39_v52 = vld [vmem:[%s4000_s3 + $0xb0] sm:$0xff]  ;;  %v100_v53 = vld [vmem:[%s4000_s3 + $0x298] sm:$0xff]  ;;  %v38_v56 = vld [vmem:[%s4000_s3 + $0xa8] sm:$0xff] }
  0x13   :  { %v83_v54 = vld [vmem:[%s4000_s3 + $0x210] sm:$0xff]  ;;  %v82_v58 = vld [vmem:[%s4000_s3 + $0x208] sm:$0xff]  ;;  %v37_v60 = vld [vmem:[%s4000_s3 + $0xa0] sm:$0xff] }
  0x14   :  { %v55_v55 = vld [vmem:[%s4000_s3 + $0x130] sm:$0xff]  ;;  %v54_v59 = vld [vmem:[%s4000_s3 + $0x128] sm:$0xff]  ;;  %v81_v62 = vld [vmem:[%s4000_s3 + $0x200] sm:$0xff] }
  0x15   :  { %v99_v57 = vld [vmem:[%s4000_s3 + $0x290] sm:$0xff]  ;;  %v98_v61 = vld [vmem:[%s4000_s3 + $0x288] sm:$0xff]  ;;  %v53_v63 = vld [vmem:[%s4000_s3 + $0x120] sm:$0xff] }
  0x16   :  { %751 = vperm.xlu1 %2298, %v71_v11   ;;  %363 = vperm.xlu0 %2297, %v27_v12   ;;  %v36_v0 = vld [vmem:[%s4000_s3 + $0x98] sm:$0xff]  ;;  %v257_v2 = vld [vmem:[%s4001_s0 + $0xf0] sm:$0xff]  ;;  %v97_v5 = vld [vmem:[%s4000_s3 + $0x280] sm:$0xff] }
  0x17   :  { %v258_v3 = vld [vmem:[%s4001_s0 + $0xf8] sm:$0xff]  ;;  %v255_v8 = vld [vmem:[%s4001_s0 + $0xe0] sm:$0xff]  ;;  %v256_v11 = vld [vmem:[%s4001_s0 + $0xe8] sm:$0xff] }
  0x18   :  { %v80_v9 = vld [vmem:[%s4000_s3 + $0x1f8] sm:$0xff] }
  0x1a   :  { %746 = vperm.xlu1 %2298, %v70_v13   ;;  %358 = vperm.xlu0 %2297, %v26_v14   ;;  %v174_v13 = vld [vmem:[%s4002_s1 + $0xf8] sm:$0xff]  ;;  %v173_v14 = vld [vmem:[%s4002_s1 + $0xf0] sm:$0xff] }
  0x1e   :  { %741 = vperm.xlu1 %2298, %v69_v15   ;;  %353 = vperm.xlu0 %2297, %v25_v16   ;;  %v52_v15 = vld [vmem:[%s4000_s3 + $0x118] sm:$0xff] }
  0x22   :  { %736 = vperm.xlu1 %2298, %v68_v17   ;;  %348 = vperm.xlu0 %2297, %v24_v18   ;;  %v253_v18 = vld [vmem:[%s4001_s0 + $0xd0] sm:$0xff] }
  0x26   :  { %731 = vperm.xlu1 %2298, %v67_v19   ;;  %343 = vperm.xlu0 %2297, %v23_v20   ;;  %v254_v19 = vld [vmem:[%s4001_s0 + $0xd8] sm:$0xff]  ;;  %v35_v20 = vld [vmem:[%s4000_s3 + $0x90] sm:$0xff] }
  0x2a   :  { %726 = vperm.xlu1 %2298, %v66_v21   ;;  %338 = vperm.xlu0 %2297, %v22_v22  }
  0x2e   :  { %721 = vperm.xlu1 %2298, %v65_v23   ;;  %333 = vperm.xlu0 %2297, %v21_v24  }
  0x32   :  { %716 = vperm.xlu1 %2298, %v64_v25   ;;  %328 = vperm.xlu0 %2297, %v20_v26   ;;  %v171_v25 = vld [vmem:[%s4002_s1 + $0xe0] sm:$0xff]  ;;  %v172_v26 = vld [vmem:[%s4002_s1 + $0xe8] sm:$0xff] }
  0x36   :  { %711 = vperm.xlu1 %2298, %v63_v27   ;;  %323 = vperm.xlu0 %2297, %v19_v28  }
  0x3a   :  { %701 = vperm.xlu1 %2298, %v61_v29   ;;  %706 = vperm.xlu0 %2297, %v62_v30  }
  0x3e   :  { %696 = vperm.xlu1 %2298, %v60_v31   ;;  %468 = vperm.xlu0 %2297, %v48_v32   ;;  %v96_v31 = vld [vmem:[%s4000_s3 + $0x278] sm:$0xff] }
  0x42   :  { %691 = vperm.xlu1 %2298, %v59_v33   ;;  %463 = vperm.xlu0 %2297, %v47_v34   ;;  %v79_v34 = vld [vmem:[%s4000_s3 + $0x1f0] sm:$0xff] }
  0x46   :  { %846 = vperm.xlu1 %2298, %v90_v35   ;;  %458 = vperm.xlu0 %2297, %v46_v36  }
  0x4a   :  { %841 = vperm.xlu1 %2298, %v89_v37   ;;  %453 = vperm.xlu0 %2297, %v45_v38   ;;  %v169_v37 = vld [vmem:[%s4002_s1 + $0xd0] sm:$0xff]  ;;  %v170_v38 = vld [vmem:[%s4002_s1 + $0xd8] sm:$0xff] }
  0x4e   :  { %836 = vperm.xlu1 %2298, %v88_v39   ;;  %448 = vperm.xlu0 %2297, %v44_v40  }
  0x52   :  { %831 = vperm.xlu1 %2298, %v87_v41   ;;  %443 = vperm.xlu0 %2297, %v43_v42   ;;  %v251_v41 = vld [vmem:[%s4001_s0 + $0xc0] sm:$0xff]  ;;  %v252_v42 = vld [vmem:[%s4001_s0 + $0xc8] sm:$0xff] }
  0x56   :  { %826 = vperm.xlu1 %2298, %v86_v43   ;;  %438 = vperm.xlu0 %2297, %v42_v44  }
  0x5a   :  { %518 = vperm.xlu1 %2298, %v58_v45   ;;  %433 = vperm.xlu0 %2297, %v41_v46  }
  0x5e   :  { %428 = vperm.xlu1 %2298, %v40_v47   ;;  %821 = vperm.xlu0 %2297, %v85_v48   ;;  %v51_v47 = vld [vmem:[%s4000_s3 + $0x110] sm:$0xff] }
  0x62   :  { %816 = vperm.xlu1 %2298, %v84_v49   ;;  %513 = vperm.xlu0 %2297, %v57_v50   ;;  %v249_v50 = vld [vmem:[%s4001_s0 + $0xb0] sm:$0xff] }
  0x66   :  { %508 = vperm.xlu1 %2298, %v56_v51   ;;  %423 = vperm.xlu0 %2297, %v39_v52   ;;  %v250_v51 = vld [vmem:[%s4001_s0 + $0xb8] sm:$0xff]  ;;  %v34_v52 = vld [vmem:[%s4000_s3 + $0x88] sm:$0xff] }
  0x6a   :  { %896 = vperm.xlu1 %2298, %v100_v53   ;;  %811 = vperm.xlu0 %2297, %v83_v54  }
  0x6e   :  { %503 = vperm.xlu1 %2298, %v55_v55   ;;  %418 = vperm.xlu0 %2297, %v38_v56  }
  0x72   :  { %891 = vperm.xlu1 %2298, %v99_v57   ;;  %806 = vperm.xlu0 %2297, %v82_v58   ;;  %v167_v57 = vld [vmem:[%s4002_s1 + $0xc0] sm:$0xff]  ;;  %v168_v58 = vld [vmem:[%s4002_s1 + $0xc8] sm:$0xff] }
  0x76   :  { %498 = vperm.xlu1 %2298, %v54_v59   ;;  %413 = vperm.xlu0 %2297, %v37_v60  }
  0x7a   :  { %886 = vperm.xlu1 %2298, %v98_v61   ;;  %801 = vperm.xlu0 %2297, %v81_v62  }
  0x7d   :  { %v389_v1 = vpop.permute.xlu1 %388  ;;  %v2524_v4 = vpop.permute.xlu0 %313 }
  0x7e   :  { %493 = vperm.xlu1 %2298, %v53_v63   ;;  %408 = vperm.xlu0 %2297, %v36_v0   ;;  %v551_v6 = vmul.f32 %v389_v1, %v257_v2  ;;  %v552_v7 = vmul.f32 %v389_v1, %v258_v3  ;;  %v95_v63 = vld [vmem:[%s4000_s3 + $0x270] sm:$0xff]  ;;  %v78_v2 = vld [vmem:[%s4000_s3 + $0x1e8] sm:$0xff] }
  0x80   :  { %v636_v21 = vadd.f32 %v552_v7, %v174_v13  ;;  %v635_v22 = vadd.f32 %v551_v6, %v173_v14  ;;  %v165_v6 = vld [vmem:[%s4002_s1 + $0xb0] sm:$0xff]  ;;  %v166_v7 = vld [vmem:[%s4002_s1 + $0xb8] sm:$0xff] }
  0x81   :  { %v384_v10 = vpop.permute.xlu1 %383  ;;  %v2538_v12 = vpop.permute.xlu0 %318 }
  0x82   :  { %881 = vperm.xlu1 %2298, %v97_v5   ;;  %796 = vperm.xlu0 %2297, %v80_v9   ;;  %v549_v16 = vmul.f32 %v384_v10, %v255_v8  ;;  %v550_v17 = vmul.f32 %v384_v10, %v256_v11  ;;  %v247_v10 = vld [vmem:[%s4001_s0 + $0xa0] sm:$0xff]  ;;  %v248_v11 = vld [vmem:[%s4001_s0 + $0xa8] sm:$0xff] }
  0x84   :  { %v633_v32 = vadd.f32 %v549_v16, %v171_v25  ;;  %v634_v33 = vadd.f32 %v550_v17, %v172_v26  ;;  %v50_v17 = vld [vmem:[%s4000_s3 + $0x108] sm:$0xff] }
  0x85   :  { %v767_v23 = vpop.permute.xlu1 %766  ;;  %v379_v24 = vpop.permute.xlu0 %378 }
  0x86   :  { %488 = vperm.xlu1 %2298, %v52_v15   ;;  %v930_v27 = vadd.f32 %v767_v23, %v636_v21  ;;  %v929_v28 = vadd.f32 %v767_v23, %v635_v22  ;;  %v547_v29 = vmul.f32 %v379_v24, %v253_v18  ;;  %v548_v30 = vmul.f32 %v379_v24, %v254_v19  ;;  %v246_v21 = vld [vmem:[%s4001_s0 + $0x98] sm:$0xff]  ;;  %v33_v22 = vld [vmem:[%s4000_s3 + $0x80] sm:$0xff] }
  0x87   :  { %403 = vperm.xlu0 %2297, %v35_v20   ;;  %v245_v20 = vld [vmem:[%s4001_s0 + $0x90] sm:$0xff] }
  0x88   :  { %v1014_v35 = vmax.f32 %v930_v27, 0.0  ;;  %v1013_v36 = vmax.f32 %v929_v28, 0.0  ;;  %v631_v45 = vadd.f32 %v547_v29, %v169_v37  ;;  %v632_v46 = vadd.f32 %v548_v30, %v170_v38  ;;  %v163_v27 = vld [vmem:[%s4002_s1 + $0xa0] sm:$0xff]  ;;  %v164_v28 = vld [vmem:[%s4002_s1 + $0xa8] sm:$0xff] }
  0x89   :  { %v762_v39 = vpop.permute.xlu1 %761  ;;  %v374_v40 = vpop.permute.xlu0 %373 }
  0x8a   :  { %v927_v43 = vadd.f32 %v762_v39, %v633_v32  ;;  %v928_v44 = vadd.f32 %v762_v39, %v634_v33  ;;  %876 = vperm.xlu1 %2298, %v96_v31   ;;  %1530 = vmatprep.subr.mxu0 %v1014_v35  ;;  %v545_v48 = vmul.f32 %v374_v40, %v251_v41  ;;  %v94_v33 = vld [vmem:[%s4000_s3 + $0x268] sm:$0xff]  ;;  %v161_v39 = vld [vmem:[%s4002_s1 + $0x90] sm:$0xff] }
  0x8b   :  { %791 = vperm.xlu0 %2297, %v79_v34   ;;  %v546_v49 = vmul.f32 %v374_v40, %v252_v42  ;;  %1531 = vmatpush1.msra.mxu0 %v1013_v36  ;;  %v77_v36 = vld [vmem:[%s4000_s3 + $0x1e0] sm:$0xff]  ;;  %v162_v40 = vld [vmem:[%s4002_s1 + $0x98] sm:$0xff] }
  0x8c   :  { %v1012_v53 = vmax.f32 %v928_v44, 0.0  ;;  %v1011_v54 = vmax.f32 %v927_v43, 0.0  ;;  %v629_v0 = vadd.f32 %v545_v48, %v167_v57  ;;  %v243_v43 = vld [vmem:[%s4001_s0 + $0x80] sm:$0xff]  ;;  %v244_v44 = vld [vmem:[%s4001_s0 + $0x88] sm:$0xff] }
  0x8d   :  { %v757_v55 = vpop.permute.xlu1 %756  ;;  %v369_v56 = vpop.permute.xlu0 %368  ;;  %v630_v1 = vadd.f32 %v546_v49, %v168_v58  ;;  %v76_v49 = vld [vmem:[%s4000_s3 + $0x1d8] sm:$0xff] }
  0x8e   :  { %v925_v59 = vadd.f32 %v757_v55, %v631_v45  ;;  %v926_v60 = vadd.f32 %v757_v55, %v632_v46  ;;  %483 = vperm.xlu1 %2298, %v51_v47   ;;  %v543_v61 = vmul.f32 %v369_v56, %v249_v50  ;;  %v544_v62 = vmul.f32 %v369_v56, %v250_v51 }
  0x8f   :  { %398 = vperm.xlu0 %2297, %v34_v52   ;;  %1532 = vmatprep.subr.mxu0 %v1012_v53  ;;  %v241_v52 = vld [vmem:[%s4001_s0 + $0x70] sm:$0xff]  ;;  %v242_v53 = vld [vmem:[%s4001_s0 + $0x78] sm:$0xff] }
  0x90   :  { %1533 = vmatpush1.msra.mxu0 %v1011_v54  ;;  %v1010_v3 = vmax.f32 %v926_v60, 0.0  ;;  %v1009_v5 = vmax.f32 %v925_v59, 0.0  ;;  %v627_v15 = vadd.f32 %v543_v61, %v165_v6  ;;  %v628_v16 = vadd.f32 %v544_v62, %v166_v7  ;;  %v49_v54 = vld [vmem:[%s4000_s3 + $0x100] sm:$0xff]  ;;  %v160_v60 = vld [vmem:[%s4002_s1 + $0x88] sm:$0xff] }
  0x91   :  { %v752_v8 = vpop.permute.xlu1 %751  ;;  %v364_v9 = vpop.permute.xlu0 %363  ;;  %v159_v59 = vld [vmem:[%s4002_s1 + $0x80] sm:$0xff] }
  0x92   :  { %v923_v13 = vadd.f32 %v752_v8, %v629_v0  ;;  %v924_v14 = vadd.f32 %v752_v8, %v630_v1  ;;  %871 = vperm.xlu1 %2298, %v95_v63   ;;  %1534 = vmatprep.subr.mxu0 %v1010_v3  ;;  %v541_v18 = vmul.f32 %v364_v9, %v247_v10  ;;  %v75_v1 = vld [vmem:[%s4000_s3 + $0x1d0] sm:$0xff] }
  0x93   :  { %786 = vperm.xlu0 %2297, %v78_v2   ;;  %v542_v19 = vmul.f32 %v364_v9, %v248_v11  ;;  %1535 = vmatpush1.msra.mxu0 %v1009_v5  ;;  %v93_v5 = vld [vmem:[%s4000_s3 + $0x260] sm:$0xff]  ;;  %v157_v8 = vld [vmem:[%s4002_s1 + $0x70] sm:$0xff]  ;;  %v158_v9 = vld [vmem:[%s4002_s1 + $0x78] sm:$0xff] }
  0x94   :  { %v1008_v23 = vmax.f32 %v924_v14, 0.0  ;;  %v1007_v24 = vmax.f32 %v923_v13, 0.0  ;;  %v625_v34 = vadd.f32 %v541_v18, %v163_v27  ;;  %v239_v13 = vld [vmem:[%s4001_s0 + $0x60] sm:$0xff]  ;;  %v240_v14 = vld [vmem:[%s4001_s0 + $0x68] sm:$0xff] }
  0x95   :  { %v747_v25 = vpop.permute.xlu1 %746  ;;  %v359_v26 = vpop.permute.xlu0 %358  ;;  %v626_v35 = vadd.f32 %v542_v19, %v164_v28  ;;  %v237_v19 = vld [vmem:[%s4001_s0 + $0x50] sm:$0xff]  ;;  %v1068_v27 = vld [vmem:[%s4003_s2 + $0x8] sm:$0xff] }
  0x96   :  { %v921_v29 = vadd.f32 %v747_v25, %v627_v15  ;;  %v922_v30 = vadd.f32 %v747_v25, %v628_v16  ;;  %478 = vperm.xlu1 %2298, %v50_v17   ;;  %v539_v31 = vmul.f32 %v359_v26, %v245_v20  ;;  %v540_v32 = vmul.f32 %v359_v26, %v246_v21  ;;  %v91_v20 = vld [vmem:[%s4000_s3 + $0x250] sm:$0xff] }
  0x97   :  { %393 = vperm.xlu0 %2297, %v33_v22   ;;  %1536 = vmatprep.subr.mxu0 %v1008_v23  ;;  %v238_v23 = vld [vmem:[%s4001_s0 + $0x58] sm:$0xff] }
  0x98   :  { %1537 = vmatpush1.msra.mxu0 %v1007_v24  ;;  %v1006_v37 = vmax.f32 %v922_v30, 0.0  ;;  %v1005_v38 = vmax.f32 %v921_v29, 0.0  ;;  %v623_v47 = vadd.f32 %v539_v31, %v161_v39  ;;  %v624_v48 = vadd.f32 %v540_v32, %v162_v40  ;;  %v92_v24 = vld [vmem:[%s4000_s3 + $0x258] sm:$0xff]  ;;  %v155_v30 = vld [vmem:[%s4002_s1 + $0x60] sm:$0xff]  ;;  %v156_v31 = vld [vmem:[%s4002_s1 + $0x68] sm:$0xff]  ;;  %1594 = vmatprep.mubr.f32.mxu0 %v1068_v27 }
  0x99   :  { %v742_v41 = vpop.permute.xlu1 %741  ;;  %v354_v42 = vpop.permute.xlu0 %353  ;;  %v101_v39 = vld [vmem:[%s4000_s3 + $0x2a0] sm:$0xff] }
  0x9a   :  { %v919_v45 = vadd.f32 %v742_v41, %v625_v34  ;;  %v920_v46 = vadd.f32 %v742_v41, %v626_v35  ;;  %866 = vperm.xlu1 %2298, %v94_v33   ;;  %1538 = vmatprep.subr.mxu0 %v1006_v37  ;;  %v537_v50 = vmul.f32 %v354_v42, %v243_v43  ;;  %v154_v43 = vld [vmem:[%s4002_s1 + $0x58] sm:$0xff] }
  0x9b   :  { %781 = vperm.xlu0 %2297, %v77_v36   ;;  %v538_v51 = vmul.f32 %v354_v42, %v244_v44  ;;  %1539 = vmatpush1.msra.mxu0 %v1005_v38  ;;  %v102_v36 = vld [vmem:[%s4000_s3 + $0x2a8] sm:$0xff]  ;;  %v153_v42 = vld [vmem:[%s4002_s1 + $0x50] sm:$0xff] }
  0x9c   :  { %v1004_v55 = vmax.f32 %v920_v46, 0.0  ;;  %v1003_v56 = vmax.f32 %v919_v45, 0.0  ;;  %v621_v2 = vadd.f32 %v537_v50, %v159_v59  ;;  %v235_v46 = vld [vmem:[%s4001_s0 + $0x40] sm:$0xff] }
  0x9d   :  { %v737_v57 = vpop.permute.xlu1 %736  ;;  %v349_v58 = vpop.permute.xlu0 %348  ;;  %v622_v3 = vadd.f32 %v538_v51, %v160_v60  ;;  %v2300_v60 = vmov 0.0  }
  0x9e   :  { %v917_v61 = vadd.f32 %v737_v57, %v623_v47  ;;  %v918_v62 = vadd.f32 %v737_v57, %v624_v48  ;;  %776 = vperm.xlu1 %2298, %v76_v49   ;;  %v535_v63 = vmul.f32 %v349_v58, %v241_v52  ;;  %v536_v0 = vmul.f32 %v349_v58, %v242_v53  ;;  %v236_v47 = vld [vmem:[%s4001_s0 + $0x48] sm:$0xff]  ;;  %v104_v52 = vld [vmem:[%s4000_s3 + $0x2b8] sm:$0xff]  ;;  %v103_v57 = vld [vmem:[%s4000_s3 + $0x2b0] sm:$0xff] }
  0x9f   :  { %473 = vperm.xlu0 %2297, %v49_v54   ;;  %1540 = vmatprep.subr.mxu0 %v1004_v55  ;;  %v233_v55 = vld [vmem:[%s4001_s0 + $0x30] sm:$0xff] }
  0xa0   :  { %1541 = vmatpush1.msra.mxu0 %v1003_v56  ;;  %v1002_v6 = vmax.f32 %v918_v62, 0.0  ;;  %v1001_v7 = vmax.f32 %v917_v61, 0.0  ;;  %v619_v17 = vadd.f32 %v535_v63, %v157_v8  ;;  %v620_v18 = vadd.f32 %v536_v0, %v158_v9  ;;  %v234_v56 = vld [vmem:[%s4001_s0 + $0x38] sm:$0xff]  ;;  %1911 = vmatprep.mubr.f32.mxu1 %v2300_v60  ;;  %v151_v63 = vld [vmem:[%s4002_s1 + $0x40] sm:$0xff]  ;;  %v152_v0 = vld [vmem:[%s4002_s1 + $0x48] sm:$0xff] }
  0xa1   :  { %v732_v10 = vpop.permute.xlu1 %731  ;;  %v344_v11 = vpop.permute.xlu0 %343  ;;  %v231_v8 = vld [vmem:[%s4001_s0 + $0x20] sm:$0xff]  ;;  %v232_v9 = vld [vmem:[%s4001_s0 + $0x28] sm:$0xff] }
  0xa2   :  { %v915_v15 = vadd.f32 %v732_v10, %v621_v2  ;;  %v916_v16 = vadd.f32 %v732_v10, %v622_v3  ;;  %771 = vperm.xlu1 %2298, %v75_v1   ;;  %1542 = vmatprep.subr.mxu0 %v1002_v6  ;;  %v533_v21 = vmul.f32 %v344_v11, %v239_v13  ;;  %v229_v1 = vld [vmem:[%s4001_s0 + $0x10] sm:$0xff]  ;;  %v230_v2 = vld [vmem:[%s4001_s0 + $0x18] sm:$0xff]  ;;  %v106_v10 = vld [vmem:[%s4000_s3 + $0x2c8] sm:$0xff] }
  0xa3   :  { %861 = vperm.xlu0 %2297, %v93_v5   ;;  %v534_v22 = vmul.f32 %v344_v11, %v240_v14  ;;  %1543 = vmatpush1.msra.mxu0 %v1001_v7  ;;  %v105_v14 = vld [vmem:[%s4000_s3 + $0x2c0] sm:$0xff] }
  0xa4   :  { %v1000_v25 = vmax.f32 %v916_v16, 0.0  ;;  %v999_v26 = vmax.f32 %v915_v15, 0.0  ;;  %v617_v37 = vadd.f32 %v533_v21, %v155_v30 }
  0xa5   :  { %v727_v28 = vpop.permute.xlu1 %726  ;;  %v339_v29 = vpop.permute.xlu0 %338  ;;  %v618_v38 = vadd.f32 %v534_v22, %v156_v31  ;;  %v147_v22 = vld [vmem:[%s4002_s1 + $0x20] sm:$0xff] }
  0xa6   :  { %v913_v32 = vadd.f32 %v727_v28, %v619_v17  ;;  %v914_v33 = vadd.f32 %v727_v28, %v620_v18  ;;  %851 = vperm.xlu1 %2298, %v91_v20   ;;  %v531_v34 = vmul.f32 %v339_v29, %v237_v19  ;;  %v532_v35 = vmul.f32 %v339_v29, %v238_v23  ;;  %v149_v17 = vld [vmem:[%s4002_s1 + $0x30] sm:$0xff]  ;;  %v150_v18 = vld [vmem:[%s4002_s1 + $0x38] sm:$0xff]  ;;  %v148_v23 = vld [vmem:[%s4002_s1 + $0x28] sm:$0xff] }
  0xa7   :  { %856 = vperm.xlu0 %2297, %v92_v24   ;;  %1544 = vmatprep.subr.mxu0 %v1000_v25  ;;  %v523_v19 = vmul.f32 %v2538_v12, %v229_v1  ;;  %v227_v28 = vld [vmem:[%s4001_s0] sm:$0xff]  ;;  %v524_v29 = vmul.f32 %v2538_v12, %v230_v2 }
  0xa8   :  { %1545 = vmatpush1.msra.mxu0 %v999_v26  ;;  %v998_v40 = vmax.f32 %v914_v33, 0.0  ;;  %v997_v41 = vmax.f32 %v913_v32, 0.0  ;;  %v615_v50 = vadd.f32 %v531_v34, %v153_v42  ;;  %v616_v51 = vadd.f32 %v532_v35, %v154_v43  ;;  %v108_v32 = vld [vmem:[%s4000_s3 + $0x2d8] sm:$0xff]  ;;  %v228_v33 = vld [vmem:[%s4001_s0 + $0x8] sm:$0xff]  ;;  %v287_v1 = vld [vmem:[%s4001_s0 + $0x1e0] sm:$0xff] }
  0xa9   :  { %v722_v44 = vpop.permute.xlu1 %721  ;;  %v334_v45 = vpop.permute.xlu0 %333  ;;  %v521_v42 = vmul.f32 %v2524_v4, %v227_v28 }
  0xaa   :  { %v911_v48 = vadd.f32 %v722_v44, %v617_v37  ;;  %v912_v49 = vadd.f32 %v722_v44, %v618_v38  ;;  %1200 = vperm.xlu1 %2298, %v102_v36   ;;  %1546 = vmatprep.subr.mxu0 %v998_v40  ;;  %v529_v53 = vmul.f32 %v334_v45, %v235_v46  ;;  %v107_v36 = vld [vmem:[%s4000_s3 + $0x2d0] sm:$0xff] }
  0xab   :  { %1195 = vperm.xlu0 %2297, %v101_v39   ;;  %v530_v54 = vmul.f32 %v334_v45, %v236_v47  ;;  %1547 = vmatpush1.msra.mxu0 %v997_v41  ;;  %v145_v38 = vld [vmem:[%s4002_s1 + $0x10] sm:$0xff]  ;;  %v146_v41 = vld [vmem:[%s4002_s1 + $0x18] sm:$0xff]  ;;  %v522_v45 = vmul.f32 %v2524_v4, %v228_v33  ;;  %v143_v4 = vld [vmem:[%s4002_s1] sm:$0xff] }
  0xac   :  { %v996_v58 = vmax.f32 %v912_v49, 0.0  ;;  %v995_v59 = vmax.f32 %v911_v48, 0.0  ;;  %v613_v11 = vadd.f32 %v529_v53, %v151_v63  ;;  %v607_v47 = vadd.f32 %v523_v19, %v145_v38  ;;  %v110_v48 = vld [vmem:[%s4000_s3 + $0x2e8] sm:$0xff]  ;;  %v109_v53 = vld [vmem:[%s4000_s3 + $0x2e0] sm:$0xff] }
  0xad   :  { %v717_v61 = vpop.permute.xlu1 %716  ;;  %v329_v62 = vpop.permute.xlu0 %328  ;;  %v614_v13 = vadd.f32 %v530_v54, %v152_v0  ;;  %v144_v54 = vld [vmem:[%s4002_s1 + $0x8] sm:$0xff]  ;;  %v605_v63 = vadd.f32 %v521_v42, %v143_v4  ;;  %v115_v42 = vld [vmem:[%s4000_s3 + $0x310] sm:$0xff] }
  0xae   :  { %v909_v3 = vadd.f32 %v717_v61, %v615_v50  ;;  %v910_v5 = vadd.f32 %v717_v61, %v616_v51  ;;  %1210 = vperm.xlu1 %2298, %v104_v52   ;;  %v527_v6 = vmul.f32 %v329_v62, %v233_v55  ;;  %v528_v7 = vmul.f32 %v329_v62, %v234_v56 }
  0xaf   :  { %1205 = vperm.xlu0 %2297, %v103_v57   ;;  %1548 = vmatprep.subr.mxu0 %v996_v58  ;;  %v608_v52 = vadd.f32 %v524_v29, %v146_v41  ;;  %v289_v57 = vld [vmem:[%s4001_s0 + $0x1f0] sm:$0xff]  ;;  %v290_v58 = vld [vmem:[%s4001_s0 + $0x1f8] sm:$0xff]  ;;  %v606_v0 = vadd.f32 %v522_v45, %v144_v54 }
  0xb0   :  { %1549 = vmatpush1.msra.mxu0 %v995_v59  ;;  %v994_v15 = vmax.f32 %v910_v5, 0.0  ;;  %v993_v16 = vmax.f32 %v909_v3, 0.0  ;;  %v611_v30 = vadd.f32 %v527_v6, %v149_v17  ;;  %v612_v31 = vadd.f32 %v528_v7, %v150_v18  ;;  %v288_v7 = vld [vmem:[%s4001_s0 + $0x1e8] sm:$0xff]  ;;  %v116_v41 = vld [vmem:[%s4000_s3 + $0x318] sm:$0xff]  ;;  %v201_v45 = vld [vmem:[%s4002_s1 + $0x1d0] sm:$0xff] }
  0xb1   :  { %v712_v20 = vpop.permute.xlu1 %711  ;;  %v324_v21 = vpop.permute.xlu0 %323 }
  0xb2   :  { %v907_v24 = vadd.f32 %v712_v20, %v613_v11  ;;  %v908_v25 = vadd.f32 %v712_v20, %v614_v13  ;;  %v525_v26 = vmul.f32 %v324_v21, %v231_v8  ;;  %v526_v27 = vmul.f32 %v324_v21, %v232_v9  ;;  %1220 = vperm.xlu1 %2298, %v106_v10   ;;  %v112_v8 = vld [vmem:[%s4000_s3 + $0x2f8] sm:$0xff]  ;;  %v111_v9 = vld [vmem:[%s4000_s3 + $0x2f0] sm:$0xff]  ;;  %v203_v20 = vld [vmem:[%s4002_s1 + $0x1e0] sm:$0xff] }
  0xb3   :  { %1215 = vperm.xlu0 %2297, %v105_v14   ;;  %1550 = vmatprep.subr.mxu0 %v994_v15  ;;  %v205_v14 = vld [vmem:[%s4002_s1 + $0x1f0] sm:$0xff]  ;;  %v206_v15 = vld [vmem:[%s4002_s1 + $0x1f8] sm:$0xff] }
  0xb4   :  { %1551 = vmatpush1.msra.mxu0 %v993_v16  ;;  %v609_v34 = vadd.f32 %v525_v26, %v147_v22  ;;  %v610_v35 = vadd.f32 %v526_v27, %v148_v23  ;;  %v992_v12 = vmax.f32 %v908_v25, 0.0  ;;  %v991_v37 = vmax.f32 %v907_v24, 0.0  ;;  %v114_v25 = vld [vmem:[%s4000_s3 + $0x308] sm:$0xff]  ;;  %v113_v26 = vld [vmem:[%s4000_s3 + $0x300] sm:$0xff] }
  0xb5   :  { %v702_v39 = vpop.permute.xlu1 %701  ;;  %v707_v40 = vpop.permute.xlu0 %706  ;;  %v204_v27 = vld [vmem:[%s4002_s1 + $0x1e8] sm:$0xff] }
  0xb6   :  { %v905_v43 = vadd.f32 %v707_v40, %v611_v30  ;;  %v906_v44 = vadd.f32 %v707_v40, %v612_v31  ;;  %1230 = vperm.xlu1 %2298, %v108_v32   ;;  %v904_v46 = vadd.f32 %v702_v39, %v610_v35  ;;  %1552 = vmatprep.subr.mxu0 %v992_v12  ;;  %v285_v30 = vld [vmem:[%s4001_s0 + $0x1d0] sm:$0xff]  ;;  %v286_v31 = vld [vmem:[%s4001_s0 + $0x1d8] sm:$0xff]  ;;  %v284_v40 = vld [vmem:[%s4001_s0 + $0x1c8] sm:$0xff] }
  0xb7   :  { %1225 = vperm.xlu0 %2297, %v107_v36   ;;  %v903_v49 = vadd.f32 %v702_v39, %v609_v34  ;;  %1553 = vmatpush1.msra.mxu0 %v991_v37  ;;  %v283_v36 = vld [vmem:[%s4001_s0 + $0x1c0] sm:$0xff] }
  0xb8   :  { %v989_v50 = vmax.f32 %v905_v43, 0.0  ;;  %v990_v51 = vmax.f32 %v906_v44, 0.0  ;;  %v988_v62 = vmax.f32 %v904_v46, 0.0  ;;  %v202_v46 = vld [vmem:[%s4002_s1 + $0x1d8] sm:$0xff] }
  0xb9   :  { %v697_v55 = vpop.permute.xlu1 %696  ;;  %v469_v56 = vpop.permute.xlu0 %468  ;;  %v987_v2 = vmax.f32 %v903_v49, 0.0 }
  0xba   :  { %v901_v59 = vadd.f32 %v697_v55, %v607_v47  ;;  %v902_v61 = vadd.f32 %v697_v55, %v608_v52  ;;  %1240 = vperm.xlu1 %2298, %v110_v48   ;;  %1554 = vmatprep.subr.mxu0 %v990_v51  ;;  %v583_v5 = vmul.f32 %v469_v56, %v289_v57  ;;  %v199_v51 = vld [vmem:[%s4002_s1 + $0x1c0] sm:$0xff]  ;;  %v118_v55 = vld [vmem:[%s4000_s3 + $0x328] sm:$0xff] }
  0xbb   :  { %1235 = vperm.xlu0 %2297, %v109_v53   ;;  %v584_v6 = vmul.f32 %v469_v56, %v290_v58  ;;  %1555 = vmatpush1.msra.mxu0 %v989_v50  ;;  %v117_v56 = vld [vmem:[%s4000_s3 + $0x320] sm:$0xff]  ;;  %v200_v57 = vld [vmem:[%s4002_s1 + $0x1c8] sm:$0xff] }
  0xbc   :  { %v986_v3 = vmax.f32 %v902_v61, 0.0  ;;  %v985_v10 = vmax.f32 %v901_v59, 0.0  ;;  %1556 = vmatprep.subr.mxu0 %v988_v62  ;;  %v667_v23 = vadd.f32 %v583_v5, %v205_v14  ;;  %v281_v61 = vld [vmem:[%s4001_s0 + $0x1b0] sm:$0xff]  ;;  %v282_v62 = vld [vmem:[%s4001_s0 + $0x1b8] sm:$0xff] }
  0xbd   :  { %v692_v11 = vpop.permute.xlu1 %691  ;;  %v464_v13 = vpop.permute.xlu0 %463  ;;  %1557 = vmatpush1.msra.mxu0 %v987_v2  ;;  %v668_v24 = vadd.f32 %v584_v6, %v206_v15  ;;  %v198_v14 = vld [vmem:[%s4002_s1 + $0x1b8] sm:$0xff] }
  0xbe   :  { %v899_v16 = vadd.f32 %v692_v11, %v605_v63  ;;  %v900_v17 = vadd.f32 %v692_v11, %v606_v0  ;;  %v581_v18 = vmul.f32 %v464_v13, %v287_v1  ;;  %v582_v19 = vmul.f32 %v464_v13, %v288_v7  ;;  %1250 = vperm.xlu1 %2298, %v112_v8   ;;  %v120_v8 = vld [vmem:[%s4000_s3 + $0x338] sm:$0xff]  ;;  %v197_v13 = vld [vmem:[%s4002_s1 + $0x1b0] sm:$0xff] }
  0xbf   :  { %1245 = vperm.xlu0 %2297, %v111_v9   ;;  %1558 = vmatprep.subr.mxu0 %v986_v3  ;;  %v119_v9 = vld [vmem:[%s4000_s3 + $0x330] sm:$0xff] }
  0xc0   :  { %v983_v21 = vmax.f32 %v899_v16, 0.0  ;;  %v984_v22 = vmax.f32 %v900_v17, 0.0  ;;  %1559 = vmatpush1.msra.mxu0 %v985_v10  ;;  %v665_v34 = vadd.f32 %v581_v18, %v203_v20  ;;  %v666_v35 = vadd.f32 %v582_v19, %v204_v27 }
  0xc1   :  { %v847_v28 = vpop.permute.xlu1 %846  ;;  %v459_v29 = vpop.permute.xlu0 %458 }
  0xc2   :  { %v961_v32 = vadd.f32 %v847_v28, %v667_v23  ;;  %v962_v33 = vadd.f32 %v847_v28, %v668_v24  ;;  %1560 = vmatprep.subr.mxu0 %v984_v22  ;;  %1260 = vperm.xlu1 %2298, %v114_v25   ;;  %v579_v38 = vmul.f32 %v459_v29, %v285_v30  ;;  %v121_v22 = vld [vmem:[%s4000_s3 + $0x340] sm:$0xff]  ;;  %v280_v24 = vld [vmem:[%s4001_s0 + $0x1a8] sm:$0xff] }
  0xc3   :  { %1255 = vperm.xlu0 %2297, %v113_v26   ;;  %v580_v39 = vmul.f32 %v459_v29, %v286_v31  ;;  %1561 = vmatpush1.msra.mxu0 %v983_v21  ;;  %v122_v21 = vld [vmem:[%s4000_s3 + $0x348] sm:$0xff]  ;;  %v279_v23 = vld [vmem:[%s4001_s0 + $0x1a0] sm:$0xff] }
  0xc4   :  { %v1045_v12 = vmax.f32 %v961_v32, 0.0  ;;  %v1046_v37 = vmax.f32 %v962_v33, 0.0  ;;  %v663_v4 = vadd.f32 %v579_v38, %v201_v45  ;;  %v124_v33 = vld [vmem:[%s4000_s3 + $0x358] sm:$0xff]  ;;  %v125_v45 = vld [vmem:[%s4000_s3 + $0x360] sm:$0xff] }
  0xc5   :  { %v842_v43 = vpop.permute.xlu1 %841  ;;  %v454_v44 = vpop.permute.xlu0 %453  ;;  %v664_v54 = vadd.f32 %v580_v39, %v202_v46  ;;  %v196_v39 = vld [vmem:[%s4002_s1 + $0x1a8] sm:$0xff] }
  0xc6   :  { %v959_v47 = vadd.f32 %v842_v43, %v665_v34  ;;  %v960_v48 = vadd.f32 %v842_v43, %v666_v35  ;;  %1562 = vmatprep.subr.mxu0 %v1046_v37  ;;  %v577_v49 = vmul.f32 %v454_v44, %v283_v36  ;;  %v578_v50 = vmul.f32 %v454_v44, %v284_v40  ;;  %v123_v34 = vld [vmem:[%s4000_s3 + $0x350] sm:$0xff]  ;;  %v195_v35 = vld [vmem:[%s4002_s1 + $0x1a0] sm:$0xff]  ;;  %v126_v44 = vld [vmem:[%s4000_s3 + $0x368] sm:$0xff] }
  0xc7   :  { %1270 = vperm.xlu1 %2298, %v116_v41   ;;  %1265 = vperm.xlu0 %2297, %v115_v42   ;;  %v277_v36 = vld [vmem:[%s4001_s0 + $0x190] sm:$0xff] }
  0xc8   :  { %v1043_v52 = vmax.f32 %v959_v47, 0.0  ;;  %v1044_v53 = vmax.f32 %v960_v48, 0.0  ;;  %1563 = vmatpush2.msra.mxu0 %v1045_v12  ;;  %v661_v1 = vadd.f32 %v577_v49, %v199_v51  ;;  %v662_v2 = vadd.f32 %v578_v50, %v200_v57  ;;  %v278_v12 = vld [vmem:[%s4001_s0 + $0x198] sm:$0xff]  ;;  %v193_v48 = vld [vmem:[%s4002_s1 + $0x190] sm:$0xff] }
  0xc9   :  { %v837_v58 = vpop.permute.xlu1 %836  ;;  %v449_v59 = vpop.permute.xlu0 %448  ;;  %v194_v49 = vld [vmem:[%s4002_s1 + $0x198] sm:$0xff] }
  0xca   :  { %v957_v63 = vadd.f32 %v837_v58, %v663_v4  ;;  %v958_v0 = vadd.f32 %v837_v58, %v664_v54  ;;  %1564 = vmatprep.subr.mxu0 %v1044_v53  ;;  %v575_v6 = vmul.f32 %v449_v59, %v281_v61  ;;  %v576_v7 = vmul.f32 %v449_v59, %v282_v62  ;;  %v310_v53 = vld [vmem:[%s4001_s0 + $0x298] sm:$0xff]  ;;  %v127_v58 = vld [vmem:[%s4000_s3 + $0x370] sm:$0xff]  ;;  %v275_v59 = vld [vmem:[%s4001_s0 + $0x180] sm:$0xff] }
  0xcb   :  { %1280 = vperm.xlu1 %2298, %v118_v55   ;;  %1275 = vperm.xlu0 %2297, %v117_v56   ;;  %v128_v57 = vld [vmem:[%s4000_s3 + $0x378] sm:$0xff]  ;;  %v276_v61 = vld [vmem:[%s4001_s0 + $0x188] sm:$0xff] }
  0xcc   :  { %v1041_v3 = vmax.f32 %v957_v63, 0.0  ;;  %v1042_v5 = vmax.f32 %v958_v0, 0.0  ;;  %1565 = vmatpush2.msra.mxu0 %v1043_v52  ;;  %v659_v19 = vadd.f32 %v575_v6, %v197_v13  ;;  %v660_v20 = vadd.f32 %v576_v7, %v198_v14  ;;  %v309_v52 = vld [vmem:[%s4001_s0 + $0x290] sm:$0xff] }
  0xcd   :  { %v832_v10 = vpop.permute.xlu1 %831  ;;  %v444_v11 = vpop.permute.xlu0 %443 }
  0xce   :  { %v955_v15 = vadd.f32 %v832_v10, %v661_v1  ;;  %v956_v16 = vadd.f32 %v832_v10, %v662_v2  ;;  %1566 = vmatprep.subr.mxu0 %v1042_v5  ;;  %v573_v29 = vmul.f32 %v444_v11, %v279_v23  ;;  %v574_v30 = vmul.f32 %v444_v11, %v280_v24  ;;  %v129_v10 = vld [vmem:[%s4000_s3 + $0x380] sm:$0xff]  ;;  %v225_v11 = vld [vmem:[%s4002_s1 + $0x290] sm:$0xff]  ;;  %v132_v24 = vld [vmem:[%s4000_s3 + $0x398] sm:$0xff] }
  0xcf   :  { %1290 = vperm.xlu1 %2298, %v120_v8   ;;  %1285 = vperm.xlu0 %2297, %v119_v9   ;;  %v130_v9 = vld [vmem:[%s4000_s3 + $0x388] sm:$0xff] }
  0xd0   :  { %v1039_v17 = vmax.f32 %v955_v15, 0.0  ;;  %v1040_v18 = vmax.f32 %v956_v16, 0.0  ;;  %1567 = vmatpush2.msra.mxu0 %v1041_v3  ;;  %v657_v42 = vadd.f32 %v573_v29, %v195_v35  ;;  %v658_v43 = vadd.f32 %v574_v30, %v196_v39  ;;  %v191_v15 = vld [vmem:[%s4002_s1 + $0x180] sm:$0xff]  ;;  %v192_v16 = vld [vmem:[%s4002_s1 + $0x188] sm:$0xff] }
  0xd1   :  { %v827_v25 = vpop.permute.xlu1 %826  ;;  %v439_v26 = vpop.permute.xlu0 %438  ;;  %v134_v39 = vld [vmem:[%s4000_s3 + $0x3a8] sm:$0xff] }
  0xd2   :  { %v953_v27 = vadd.f32 %v827_v25, %v659_v19  ;;  %v954_v28 = vadd.f32 %v827_v25, %v660_v20  ;;  %1568 = vmatprep.subr.mxu0 %v1040_v18  ;;  %v571_v40 = vmul.f32 %v439_v26, %v277_v36  ;;  %v572_v41 = vmul.f32 %v439_v26, %v278_v12  ;;  %v273_v18 = vld [vmem:[%s4001_s0 + $0x170] sm:$0xff]  ;;  %v274_v19 = vld [vmem:[%s4001_s0 + $0x178] sm:$0xff]  ;;  %v307_v20 = vld [vmem:[%s4001_s0 + $0x280] sm:$0xff] }
  0xd3   :  { %1300 = vperm.xlu1 %2298, %v122_v21   ;;  %1295 = vperm.xlu0 %2297, %v121_v22   ;;  %v131_v25 = vld [vmem:[%s4000_s3 + $0x390] sm:$0xff] }
  0xd4   :  { %v1037_v31 = vmax.f32 %v953_v27, 0.0  ;;  %v1038_v32 = vmax.f32 %v954_v28, 0.0  ;;  %1569 = vmatpush2.msra.mxu0 %v1039_v17  ;;  %v655_v55 = vadd.f32 %v571_v40, %v193_v48  ;;  %v656_v56 = vadd.f32 %v572_v41, %v194_v49  ;;  %v226_v17 = vld [vmem:[%s4002_s1 + $0x298] sm:$0xff]  ;;  %v308_v27 = vld [vmem:[%s4001_s0 + $0x288] sm:$0xff]  ;;  %v133_v40 = vld [vmem:[%s4000_s3 + $0x3a0] sm:$0xff] }
  0xd5   :  { %v519_v37 = vpop.permute.xlu1 %518  ;;  %v434_v38 = vpop.permute.xlu0 %433  ;;  %v190_v48 = vld [vmem:[%s4002_s1 + $0x178] sm:$0xff]  ;;  %v305_v49 = vld [vmem:[%s4001_s0 + $0x270] sm:$0xff] }
  0xd6   :  { %1570 = vmatprep.subr.mxu0 %v1038_v32  ;;  %v603_v2 = vmul.f32 %v519_v37, %v309_v52  ;;  %v604_v3 = vmul.f32 %v519_v37, %v310_v53  ;;  %v569_v5 = vmul.f32 %v434_v38, %v275_v59  ;;  %v570_v6 = vmul.f32 %v434_v38, %v276_v61  ;;  %v271_v52 = vld [vmem:[%s4001_s0 + $0x160] sm:$0xff] }
  0xd7   :  { %1310 = vperm.xlu1 %2298, %v124_v33   ;;  %1305 = vperm.xlu0 %2297, %v123_v34  }
  0xd8   :  { %1571 = vmatpush2.msra.mxu0 %v1037_v31  ;;  %v687_v21 = vadd.f32 %v603_v2, %v225_v11  ;;  %v653_v22 = vadd.f32 %v569_v5, %v191_v15  ;;  %v654_v23 = vadd.f32 %v570_v6, %v192_v16  ;;  %v688_v26 = vadd.f32 %v604_v3, %v226_v17  ;;  %v221_v11 = vld [vmem:[%s4002_s1 + $0x270] sm:$0xff]  ;;  %v187_v17 = vld [vmem:[%s4002_s1 + $0x160] sm:$0xff] }
  0xd9   :  { %v429_v46 = vpop.permute.xlu1 %428  ;;  %v822_v47 = vpop.permute.xlu0 %821 }
  0xda   :  { %v951_v50 = vadd.f32 %v822_v47, %v657_v42  ;;  %v952_v51 = vadd.f32 %v822_v47, %v658_v43  ;;  %v567_v34 = vmul.f32 %v429_v46, %v273_v18  ;;  %v568_v35 = vmul.f32 %v429_v46, %v274_v19  ;;  %v189_v42 = vld [vmem:[%s4002_s1 + $0x170] sm:$0xff]  ;;  %v223_v46 = vld [vmem:[%s4002_s1 + $0x280] sm:$0xff]  ;;  %v224_v47 = vld [vmem:[%s4002_s1 + $0x288] sm:$0xff] }
  0xdb   :  { %1320 = vperm.xlu1 %2298, %v126_v44   ;;  %1315 = vperm.xlu0 %2297, %v125_v45   ;;  %v188_v18 = vld [vmem:[%s4002_s1 + $0x168] sm:$0xff]  ;;  %v303_v19 = vld [vmem:[%s4001_s0 + $0x260] sm:$0xff] }
  0xdc   :  { %v1035_v4 = vmax.f32 %v951_v50, 0.0  ;;  %v1036_v54 = vmax.f32 %v952_v51, 0.0  ;;  %v306_v50 = vld [vmem:[%s4001_s0 + $0x278] sm:$0xff]  ;;  %v651_v51 = vadd.f32 %v567_v34, %v189_v42 }
  0xdd   :  { %v817_v62 = vpop.permute.xlu1 %816  ;;  %v514_v63 = vpop.permute.xlu0 %513 }
  0xde   :  { %v949_v0 = vadd.f32 %v817_v62, %v655_v55  ;;  %v950_v1 = vadd.f32 %v817_v62, %v656_v56  ;;  %1572 = vmatprep.subr.mxu0 %v1036_v54  ;;  %v601_v36 = vmul.f32 %v514_v63, %v307_v20  ;;  %v602_v12 = vmul.f32 %v514_v63, %v308_v27  ;;  %v136_v55 = vld [vmem:[%s4000_s3 + $0x3b8] sm:$0xff]  ;;  %v135_v56 = vld [vmem:[%s4000_s3 + $0x3b0] sm:$0xff] }
  0xdf   :  { %1330 = vperm.xlu1 %2298, %v128_v57   ;;  %1325 = vperm.xlu0 %2297, %v127_v58   ;;  %v652_v54 = vadd.f32 %v568_v35, %v190_v48  ;;  %v272_v57 = vld [vmem:[%s4001_s0 + $0x168] sm:$0xff] }
  0xe0   :  { %v1033_v7 = vmax.f32 %v949_v0, 0.0  ;;  %v1034_v8 = vmax.f32 %v950_v1, 0.0  ;;  %1573 = vmatpush2.msra.mxu0 %v1035_v4  ;;  %v685_v53 = vadd.f32 %v601_v36, %v223_v46  ;;  %v686_v4 = vadd.f32 %v602_v12, %v224_v47  ;;  %v220_v47 = vld [vmem:[%s4002_s1 + $0x268] sm:$0xff] }
  0xe1   :  { %v2971_v13 = vpop.permute.xlu1 %508  ;;  %v2973_v14 = vpop.permute.xlu0 %423 }
  0xe2   :  { %1574 = vmatprep.subr.mxu0 %v1034_v8  ;;  %v599_v1 = vmul.f32 %v2971_v13, %v305_v49  ;;  %v600_v2 = vmul.f32 %v2971_v13, %v306_v50  ;;  %v565_v3 = vmul.f32 %v2973_v14, %v271_v52  ;;  %v566_v5 = vmul.f32 %v2973_v14, %v272_v57  ;;  %v222_v14 = vld [vmem:[%s4002_s1 + $0x278] sm:$0xff]  ;;  %v185_v49 = vld [vmem:[%s4002_s1 + $0x150] sm:$0xff]  ;;  %v268_v57 = vld [vmem:[%s4001_s0 + $0x148] sm:$0xff] }
  0xe3   :  { %1340 = vperm.xlu1 %2298, %v130_v9   ;;  %1335 = vperm.xlu0 %2297, %v129_v10   ;;  %v138_v9 = vld [vmem:[%s4000_s3 + $0x3c8] sm:$0xff]  ;;  %v137_v10 = vld [vmem:[%s4000_s3 + $0x3c0] sm:$0xff]  ;;  %v301_v52 = vld [vmem:[%s4001_s0 + $0x250] sm:$0xff] }
  0xe4   :  { %1575 = vmatpush2.msra.mxu0 %v1033_v7  ;;  %v683_v20 = vadd.f32 %v599_v1, %v221_v11  ;;  %v218_v11 = vld [vmem:[%s4002_s1 + $0x258] sm:$0xff] }
  0xe5   :  { %v897_v28 = vpop.permute.xlu1 %896  ;;  %v812_v29 = vpop.permute.xlu0 %811 }
  0xe6   :  { %v981_v30 = vadd.f32 %v897_v28, %v687_v21  ;;  %v947_v31 = vadd.f32 %v812_v29, %v653_v22  ;;  %v948_v32 = vadd.f32 %v812_v29, %v654_v23  ;;  %v982_v33 = vadd.f32 %v897_v28, %v688_v26  ;;  %v304_v21 = vld [vmem:[%s4001_s0 + $0x268] sm:$0xff]  ;;  %v139_v26 = vld [vmem:[%s4000_s3 + $0x3d0] sm:$0xff] }
  0xe7   :  { %1350 = vperm.xlu1 %2298, %v132_v24   ;;  %1345 = vperm.xlu0 %2297, %v131_v25   ;;  %v684_v22 = vadd.f32 %v600_v2, %v222_v14  ;;  %v649_v23 = vadd.f32 %v565_v3, %v187_v17  ;;  %v650_v24 = vadd.f32 %v566_v5, %v188_v18  ;;  %v140_v25 = vld [vmem:[%s4000_s3 + $0x3d8] sm:$0xff]  ;;  %v269_v29 = vld [vmem:[%s4001_s0 + $0x150] sm:$0xff]  ;;  %v299_v18 = vld [vmem:[%s4001_s0 + $0x240] sm:$0xff] }
  0xe8   :  { %v1031_v37 = vmax.f32 %v947_v31, 0.0  ;;  %v1032_v38 = vmax.f32 %v948_v32, 0.0  ;;  %v1066_v41 = vmax.f32 %v982_v33, 0.0  ;;  %v1065_v45 = vmax.f32 %v981_v30, 0.0  ;;  %v270_v30 = vld [vmem:[%s4001_s0 + $0x158] sm:$0xff] }
  0xe9   :  { %v3011_v43 = vpop.permute.xlu1 %503  ;;  %v3013_v44 = vpop.permute.xlu0 %418 }
  0xea   :  { %1576 = vmatprep.subr.mxu0 %v1032_v38  ;;  %1859 = vmatprep.subr.mxu1 %v1066_v41  ;;  %v597_v35 = vmul.f32 %v3011_v43, %v303_v19  ;;  %v598_v36 = vmul.f32 %v3011_v43, %v304_v21  ;;  %v141_v41 = vld [vmem:[%s4000_s3 + $0x3e0] sm:$0xff]  ;;  %v563_v42 = vmul.f32 %v3013_v44, %v269_v29  ;;  %v300_v19 = vld [vmem:[%s4001_s0 + $0x248] sm:$0xff] }
  0xeb   :  { %1360 = vperm.xlu1 %2298, %v134_v39   ;;  %1355 = vperm.xlu0 %2297, %v133_v40   ;;  %v142_v40 = vld [vmem:[%s4000_s3 + $0x3e8] sm:$0xff]  ;;  %v219_v43 = vld [vmem:[%s4002_s1 + $0x260] sm:$0xff] }
  0xec   :  { %1577 = vmatpush2.msra.mxu0 %v1031_v37  ;;  %1860 = vmatpush1.msra.mxu1 %v1065_v45  ;;  %v564_v45 = vmul.f32 %v3013_v44, %v270_v30  ;;  %v186_v44 = vld [vmem:[%s4002_s1 + $0x158] sm:$0xff]  ;;  %v681_v50 = vadd.f32 %v597_v35, %v219_v43  ;;  %v297_v43 = vld [vmem:[%s4001_s0 + $0x230] sm:$0xff] }
  0xed   :  { %v892_v58 = vpop.permute.xlu1 %891  ;;  %v807_v59 = vpop.permute.xlu0 %806 }
  0xee   :  { %v979_v61 = vadd.f32 %v892_v58, %v685_v53  ;;  %v980_v62 = vadd.f32 %v892_v58, %v686_v4  ;;  %v945_v63 = vadd.f32 %v807_v59, %v651_v51  ;;  %v946_v0 = vadd.f32 %v807_v59, %v652_v54  ;;  %v302_v53 = vld [vmem:[%s4001_s0 + $0x258] sm:$0xff] }
  0xef   :  { %1370 = vperm.xlu1 %2298, %v136_v55   ;;  %1365 = vperm.xlu0 %2297, %v135_v56   ;;  %v682_v51 = vadd.f32 %v598_v36, %v220_v47  ;;  %v647_v54 = vadd.f32 %v563_v42, %v185_v49  ;;  %v648_v55 = vadd.f32 %v564_v45, %v186_v44  ;;  %v267_v56 = vld [vmem:[%s4001_s0 + $0x140] sm:$0xff]  ;;  %v182_v42 = vld [vmem:[%s4002_s1 + $0x138] sm:$0xff] }
  0xf0   :  { %v1064_v6 = vmax.f32 %v980_v62, 0.0  ;;  %v1029_v7 = vmax.f32 %v945_v63, 0.0  ;;  %v1030_v8 = vmax.f32 %v946_v0, 0.0  ;;  %v1063_v13 = vmax.f32 %v979_v61, 0.0  ;;  %v298_v47 = vld [vmem:[%s4001_s0 + $0x238] sm:$0xff] }
  0xf1   :  { %v3055_v15 = vpop.permute.xlu1 %498  ;;  %v3057_v16 = vpop.permute.xlu0 %413 }
  0xf2   :  { %1578 = vmatprep.subr.mxu0 %v1030_v8  ;;  %1861 = vmatprep.subr.mxu1 %v1064_v6  ;;  %v595_v0 = vmul.f32 %v3055_v15, %v301_v52  ;;  %v596_v1 = vmul.f32 %v3055_v15, %v302_v53  ;;  %v561_v5 = vmul.f32 %v3057_v16, %v267_v56  ;;  %v183_v15 = vld [vmem:[%s4002_s1 + $0x140] sm:$0xff] }
  0xf3   :  { %1380 = vperm.xlu1 %2298, %v138_v9   ;;  %1375 = vperm.xlu0 %2297, %v137_v10   ;;  %v562_v6 = vmul.f32 %v3057_v16, %v268_v57  ;;  %v217_v10 = vld [vmem:[%s4002_s1 + $0x250] sm:$0xff]  ;;  %v184_v16 = vld [vmem:[%s4002_s1 + $0x148] sm:$0xff] }
  0xf4   :  { %1579 = vmatpush2.msra.mxu0 %v1029_v7  ;;  %1862 = vmatpush1.msra.mxu1 %v1063_v13  ;;  %v679_v14 = vadd.f32 %v595_v0, %v217_v10  ;;  %v680_v17 = vadd.f32 %v596_v1, %v218_v11  ;;  %v645_v21 = vadd.f32 %v561_v5, %v183_v15  ;;  %v213_v5 = vld [vmem:[%s4002_s1 + $0x230] sm:$0xff] }
  0xf5   :  { %v887_v27 = vpop.permute.xlu1 %886  ;;  %v802_v28 = vpop.permute.xlu0 %801 }
  0xf6   :  { %v977_v31 = vadd.f32 %v887_v27, %v683_v20  ;;  %v978_v32 = vadd.f32 %v887_v27, %v684_v22  ;;  %v943_v33 = vadd.f32 %v802_v28, %v649_v23  ;;  %v944_v34 = vadd.f32 %v802_v28, %v650_v24  ;;  %v265_v23 = vld [vmem:[%s4001_s0 + $0x130] sm:$0xff]  ;;  %v266_v24 = vld [vmem:[%s4001_s0 + $0x138] sm:$0xff] }
  0xf7   :  { %1390 = vperm.xlu1 %2298, %v140_v25   ;;  %1385 = vperm.xlu0 %2297, %v139_v26   ;;  %v646_v22 = vadd.f32 %v562_v6, %v184_v16  ;;  %v214_v6 = vld [vmem:[%s4002_s1 + $0x238] sm:$0xff]  ;;  %v177_v16 = vld [vmem:[%s4002_s1 + $0x110] sm:$0xff] }
  0xf8   :  { %v1061_v12 = vmax.f32 %v977_v31, 0.0  ;;  %v1062_v37 = vmax.f32 %v978_v32, 0.0  ;;  %v1027_v38 = vmax.f32 %v943_v33, 0.0  ;;  %v1028_v39 = vmax.f32 %v944_v34, 0.0 }
  0xf9   :  { %v494_v46 = vpop.permute.xlu1 %493  ;;  %v409_v48 = vpop.permute.xlu0 %408 }
  0xfa   :  { %1580 = vmatprep.subr.mxu0 %v1028_v39  ;;  %1863 = vmatprep.subr.mxu1 %v1062_v37  ;;  %v593_v30 = vmul.f32 %v494_v46, %v299_v18  ;;  %v594_v31 = vmul.f32 %v494_v46, %v300_v19  ;;  %v559_v34 = vmul.f32 %v409_v48, %v265_v23  ;;  %v216_v39 = vld [vmem:[%s4002_s1 + $0x248] sm:$0xff] }
  0xfb   :  { %1400 = vperm.xlu1 %2298, %v142_v40   ;;  %1395 = vperm.xlu0 %2297, %v141_v41   ;;  %v560_v35 = vmul.f32 %v409_v48, %v266_v24  ;;  %v181_v41 = vld [vmem:[%s4002_s1 + $0x130] sm:$0xff]  ;;  %v260_v18 = vld [vmem:[%s4001_s0 + $0x108] sm:$0xff] }
  0xfc   :  { %1581 = vmatpush2.msra.mxu0 %v1027_v38  ;;  %1864 = vmatpush1.msra.mxu1 %v1061_v12  ;;  %v215_v38 = vld [vmem:[%s4002_s1 + $0x240] sm:$0xff]  ;;  %v678_v46 = vadd.f32 %v594_v31, %v216_v39  ;;  %v643_v49 = vadd.f32 %v559_v34, %v181_v41  ;;  %v296_v23 = vld [vmem:[%s4001_s0 + $0x228] sm:$0xff]  ;;  %v293_v31 = vld [vmem:[%s4001_s0 + $0x210] sm:$0xff] }
  0xfd   :  { %v882_v4 = vpop.permute.xlu1 %881  ;;  %v797_v61 = vpop.permute.xlu0 %796  ;;  %v677_v45 = vadd.f32 %v593_v30, %v215_v38  ;;  %v644_v44 = vadd.f32 %v560_v35, %v182_v42  ;;  %v175_v41 = vld [vmem:[%s4002_s1 + $0x100] sm:$0xff]  ;;  %v176_v42 = vld [vmem:[%s4002_s1 + $0x108] sm:$0xff] }
  0xfe   :  { %v975_v58 = vadd.f32 %v882_v4, %v681_v50  ;;  %v976_v59 = vadd.f32 %v882_v4, %v682_v51  ;;  %v941_v62 = vadd.f32 %v797_v61, %v647_v54  ;;  %v942_v63 = vadd.f32 %v797_v61, %v648_v55  ;;  %v263_v50 = vld [vmem:[%s4001_s0 + $0x120] sm:$0xff]  ;;  %v264_v51 = vld [vmem:[%s4001_s0 + $0x128] sm:$0xff] }
 0x100   :  { %v1059_v2 = vmax.f32 %v975_v58, 0.0  ;;  %v1060_v3 = vmax.f32 %v976_v59, 0.0  ;;  %v1025_v7 = vmax.f32 %v941_v62, 0.0  ;;  %v1026_v8 = vmax.f32 %v942_v63, 0.0  ;;  %v261_v58 = vld [vmem:[%s4001_s0 + $0x110] sm:$0xff]  ;;  %v262_v59 = vld [vmem:[%s4001_s0 + $0x118] sm:$0xff] }
 0x101   :  { %v489_v9 = vpop.permute.xlu1 %488 }
 0x102   :  { %v404_v13 = vpop.permute.xlu0 %403  ;;  %1865 = vmatprep.subr.mxu1 %v1060_v3  ;;  %1582 = vmatprep.subr.mxu0 %v1026_v8  ;;  %v591_v56 = vmul.f32 %v489_v9, %v297_v43  ;;  %v592_v57 = vmul.f32 %v489_v9, %v298_v47  ;;  %v179_v8 = vld [vmem:[%s4002_s1 + $0x120] sm:$0xff]  ;;  %v180_v9 = vld [vmem:[%s4002_s1 + $0x128] sm:$0xff] }
 0x103   :  { %1866 = vmatpush1.msra.mxu1 %v1059_v2  ;;  %1583 = vmatpush2.msra.mxu0 %v1025_v7  ;;  %v557_v63 = vmul.f32 %v404_v13, %v263_v50  ;;  %v558_v0 = vmul.f32 %v404_v13, %v264_v51  ;;  %v291_v50 = vld [vmem:[%s4001_s0 + $0x200] sm:$0xff] }
 0x104   :  { %v675_v13 = vadd.f32 %v591_v56, %v213_v5  ;;  %v676_v15 = vadd.f32 %v592_v57, %v214_v6  ;;  %v207_v6 = vld [vmem:[%s4002_s1 + $0x200] sm:$0xff] }
 0x105   :  { %v877_v20 = vpop.permute.xlu1 %876 }
 0x106   :  { %v973_v25 = vadd.f32 %v877_v20, %v679_v14  ;;  %v974_v26 = vadd.f32 %v877_v20, %v680_v17  ;;  %v792_v27 = vpop.permute.xlu0 %791  ;;  %v178_v14 = vld [vmem:[%s4002_s1 + $0x118] sm:$0xff]  ;;  %v259_v17 = vld [vmem:[%s4001_s0 + $0x100] sm:$0xff]  ;;  %v641_v20 = vadd.f32 %v557_v63, %v179_v8 }
 0x107   :  { %v939_v28 = vadd.f32 %v792_v27, %v645_v21  ;;  %v940_v29 = vadd.f32 %v792_v27, %v646_v22  ;;  %v642_v21 = vadd.f32 %v558_v0, %v180_v9  ;;  %v295_v22 = vld [vmem:[%s4001_s0 + $0x220] sm:$0xff] }
 0x108   :  { %v1057_v32 = vmax.f32 %v973_v25, 0.0  ;;  %v1058_v33 = vmax.f32 %v974_v26, 0.0 }
 0x109   :  { %v1023_v36 = vmax.f32 %v939_v28, 0.0  ;;  %v1024_v12 = vmax.f32 %v940_v29, 0.0  ;;  %v3148_v37 = vpop.permute.xlu1 %483 }
 0x10a   :  { %v399_v40 = vpop.permute.xlu0 %398  ;;  %1867 = vmatprep.subr.mxu1 %v1058_v33 }
 0x10b   :  { %1584 = vmatprep.subr.mxu0 %v1024_v12  ;;  %1868 = vmatpush1.msra.mxu1 %v1057_v32  ;;  %v555_v10 = vmul.f32 %v399_v40, %v261_v58  ;;  %v556_v11 = vmul.f32 %v399_v40, %v262_v59  ;;  %v590_v12 = vmul.f32 %v3148_v37, %v296_v23  ;;  %v209_v59 = vld [vmem:[%s4002_s1 + $0x210] sm:$0xff] }
 0x10c   :  { %1585 = vmatpush2.msra.mxu0 %v1023_v36  ;;  %v589_v36 = vmul.f32 %v3148_v37, %v295_v22 }
 0x10d   :  { %v872_v48 = vpop.permute.xlu1 %871  ;;  %v639_v29 = vadd.f32 %v555_v10, %v177_v16  ;;  %v640_v30 = vadd.f32 %v556_v11, %v178_v14  ;;  %v1067_v14 = vld [vmem:[%s4003_s2] sm:$0xff] }
 0x10e   :  { %v971_v52 = vadd.f32 %v872_v48, %v677_v45  ;;  %v972_v53 = vadd.f32 %v872_v48, %v678_v46  ;;  %v787_v4 = vpop.permute.xlu0 %786  ;;  %v211_v45 = vld [vmem:[%s4002_s1 + $0x220] sm:$0xff]  ;;  %v294_v46 = vld [vmem:[%s4001_s0 + $0x218] sm:$0xff]  ;;  %v292_v48 = vld [vmem:[%s4001_s0 + $0x208] sm:$0xff] }
 0x10f   :  { %v937_v54 = vadd.f32 %v787_v4, %v643_v49  ;;  %v938_v55 = vadd.f32 %v787_v4, %v644_v44  ;;  %v212_v49 = vld [vmem:[%s4002_s1 + $0x228] sm:$0xff]  ;;  %v673_v57 = vadd.f32 %v589_v36, %v211_v45  ;;  %v1075_v36 = vld [vmem:[%s4003_s2 + $0x40] sm:$0xff]  ;;  %v1085_v45 = vld [vmem:[%s4003_s2 + $0x90] sm:$0xff] }
 0x110   :  { %v1055_v61 = vmax.f32 %v971_v52, 0.0  ;;  %v1056_v62 = vmax.f32 %v972_v53, 0.0  ;;  %v674_v58 = vadd.f32 %v590_v12, %v212_v49  ;;  %v1079_v12 = vld [vmem:[%s4003_s2 + $0x60] sm:$0xff] }
 0x111   :  { %v1021_v1 = vmax.f32 %v937_v54, 0.0  ;;  %v1022_v2 = vmax.f32 %v938_v55, 0.0  ;;  %v479_v3 = vpop.permute.xlu1 %478  ;;  %v1091_v49 = vld [vmem:[%s4003_s2 + $0xc0] sm:$0xff] }
 0x112   :  { %v394_v7 = vpop.permute.xlu0 %393  ;;  %1869 = vmatprep.subr.mxu1 %v1056_v62  ;;  %v587_v44 = vmul.f32 %v479_v3, %v293_v31  ;;  %v588_v54 = vmul.f32 %v479_v3, %v294_v46  ;;  %v1073_v31 = vld [vmem:[%s4003_s2 + $0x30] sm:$0xff] }
 0x113   :  { %1586 = vmatprep.subr.mxu0 %v1022_v2  ;;  %1870 = vmatpush1.msra.mxu1 %v1055_v61  ;;  %v553_v32 = vmul.f32 %v394_v7, %v259_v17  ;;  %v554_v33 = vmul.f32 %v394_v7, %v260_v18  ;;  %v210_v2 = vld [vmem:[%s4002_s1 + $0x218] sm:$0xff]  ;;  %v1089_v46 = vld [vmem:[%s4003_s2 + $0xb0] sm:$0xff] }
 0x114   :  { %1587 = vmatpush2.msra.mxu0 %v1021_v1  ;;  %v208_v1 = vld [vmem:[%s4002_s1 + $0x208] sm:$0xff]  ;;  %v671_v9 = vadd.f32 %v587_v44, %v209_v59  ;;  %v672_v16 = vadd.f32 %v588_v54, %v210_v2  ;;  %v1095_v44 = vld [vmem:[%s4003_s2 + $0xe0] sm:$0xff]  ;;  %v1101_v54 = vld [vmem:[%s4003_s2 + $0x110] sm:$0xff] }
 0x115   :  { %v867_v19 = vpop.permute.xlu1 %866  ;;  %v637_v53 = vadd.f32 %v553_v32, %v175_v41  ;;  %v638_v4 = vadd.f32 %v554_v33, %v176_v42  ;;  %v1077_v32 = vld [vmem:[%s4003_s2 + $0x50] sm:$0xff]  ;;  %v1072_v33 = vld [vmem:[%s4003_s2 + $0x28] sm:$0xff]  ;;  %v1086_v41 = vld [vmem:[%s4003_s2 + $0x98] sm:$0xff] }
 0x116   :  { %v969_v24 = vadd.f32 %v867_v19, %v675_v13  ;;  %v970_v25 = vadd.f32 %v867_v19, %v676_v15  ;;  %v782_v26 = vpop.permute.xlu0 %781  ;;  %v1071_v19 = vld [vmem:[%s4003_s2 + $0x20] sm:$0xff]  ;;  %v1081_v42 = vld [vmem:[%s4003_s2 + $0x70] sm:$0xff] }
 0x117   :  { %v935_v27 = vadd.f32 %v782_v26, %v641_v20  ;;  %v936_v28 = vadd.f32 %v782_v26, %v642_v21  ;;  %v1070_v26 = vld [vmem:[%s4003_s2 + $0x18] sm:$0xff]  ;;  %v1103_v59 = vld [vmem:[%s4003_s2 + $0x120] sm:$0xff]  ;;  %v1109_v2 = vld [vmem:[%s4003_s2 + $0x150] sm:$0xff] }
 0x118   :  { %v1053_v34 = vmax.f32 %v969_v24, 0.0  ;;  %v1054_v35 = vmax.f32 %v970_v25, 0.0 }
 0x119   :  { %v1019_v38 = vmax.f32 %v935_v27, 0.0  ;;  %v1020_v39 = vmax.f32 %v936_v28, 0.0  ;;  %v777_v40 = vpop.permute.xlu1 %776  ;;  %v1074_v27 = vld [vmem:[%s4003_s2 + $0x38] sm:$0xff] }
 0x11a   :  { %v933_v37 = vadd.f32 %v777_v40, %v639_v29  ;;  %v934_v43 = vadd.f32 %v777_v40, %v640_v30  ;;  %v474_v47 = vpop.permute.xlu0 %473  ;;  %1871 = vmatprep.subr.mxu1 %v1054_v35  ;;  %v1069_v30 = vld [vmem:[%s4003_s2 + $0x10] sm:$0xff]  ;;  %v1080_v35 = vld [vmem:[%s4003_s2 + $0x68] sm:$0xff]  ;;  %v1082_v40 = vld [vmem:[%s4003_s2 + $0x78] sm:$0xff] }
 0x11b   :  { %1588 = vmatprep.subr.mxu0 %v1020_v39  ;;  %1872 = vmatpush1.msra.mxu1 %v1053_v34  ;;  %v586_v55 = vmul.f32 %v474_v47, %v292_v48  ;;  %v585_v61 = vmul.f32 %v474_v47, %v291_v50  ;;  %v1076_v34 = vld [vmem:[%s4003_s2 + $0x48] sm:$0xff]  ;;  %v1078_v39 = vld [vmem:[%s4003_s2 + $0x58] sm:$0xff]  ;;  %v1087_v48 = vld [vmem:[%s4003_s2 + $0xa0] sm:$0xff] }
 0x11c   :  { %v1017_v51 = vmax.f32 %v933_v37, 0.0  ;;  %v1018_v52 = vmax.f32 %v934_v43, 0.0  ;;  %1589 = vmatpush2.msra.mxu0 %v1019_v38  ;;  %v1083_v38 = vld [vmem:[%s4003_s2 + $0x80] sm:$0xff]  ;;  %v1084_v37 = vld [vmem:[%s4003_s2 + $0x88] sm:$0xff]  ;;  %v1090_v50 = vld [vmem:[%s4003_s2 + $0xb8] sm:$0xff] }
 0x11d   :  { %v772_v56 = vpop.permute.xlu1 %771  ;;  %v670_v15 = vadd.f32 %v586_v55, %v208_v1  ;;  %v669_v17 = vadd.f32 %v585_v61, %v207_v6  ;;  %v1088_v43 = vld [vmem:[%s4003_s2 + $0xa8] sm:$0xff]  ;;  %v1107_v61 = vld [vmem:[%s4003_s2 + $0x140] sm:$0xff]  ;;  %v1105_v1 = vld [vmem:[%s4003_s2 + $0x130] sm:$0xff] }
 0x11e   :  { %v931_v62 = vadd.f32 %v772_v56, %v637_v53  ;;  %v932_v63 = vadd.f32 %v772_v56, %v638_v4  ;;  %v862_v0 = vpop.permute.xlu0 %861  ;;  %1590 = vmatprep.subr.mxu0 %v1018_v52  ;;  %v1092_v47 = vld [vmem:[%s4003_s2 + $0xc8] sm:$0xff]  ;;  %v1098_v52 = vld [vmem:[%s4003_s2 + $0xf8] sm:$0xff]  ;;  %v1093_v53 = vld [vmem:[%s4003_s2 + $0xd0] sm:$0xff] }
 0x11f   :  { %v967_v3 = vadd.f32 %v862_v0, %v673_v57  ;;  %v968_v5 = vadd.f32 %v862_v0, %v674_v58  ;;  %1591 = vmatpush2.msra.mxu0 %v1017_v51  ;;  %v1094_v51 = vld [vmem:[%s4003_s2 + $0xd8] sm:$0xff]  ;;  %v1097_v4 = vld [vmem:[%s4003_s2 + $0xf0] sm:$0xff]  ;;  %v1096_v55 = vld [vmem:[%s4003_s2 + $0xe8] sm:$0xff] }
 0x120   :  { %v1015_v7 = vmax.f32 %v931_v62, 0.0  ;;  %v1016_v8 = vmax.f32 %v932_v63, 0.0  ;;  %v1100_v56 = vld [vmem:[%s4003_s2 + $0x108] sm:$0xff]  ;;  %v1099_v58 = vld [vmem:[%s4003_s2 + $0x100] sm:$0xff]  ;;  %v1102_v62 = vld [vmem:[%s4003_s2 + $0x118] sm:$0xff] }
 0x121   :  { %v1051_v10 = vmax.f32 %v967_v3, 0.0  ;;  %v1052_v11 = vmax.f32 %v968_v5, 0.0  ;;  %v852_v13 = vpop.permute.xlu1 %851  ;;  %v1104_v57 = vld [vmem:[%s4003_s2 + $0x128] sm:$0xff]  ;;  %v1106_v63 = vld [vmem:[%s4003_s2 + $0x138] sm:$0xff]  ;;  %v1113_v3 = vld [vmem:[%s4003_s2 + $0x170] sm:$0xff] }
 0x122   :  { %v857_v18 = vpop.permute.xlu0 %856  ;;  %1592 = vmatprep.subr.mxu0 %v1016_v8  ;;  %v964_v20 = vadd.f32 %v852_v13, %v670_v15  ;;  %v963_v23 = vadd.f32 %v852_v13, %v669_v17  ;;  %v1110_v0 = vld [vmem:[%s4003_s2 + $0x158] sm:$0xff]  ;;  %v1108_v5 = vld [vmem:[%s4003_s2 + $0x148] sm:$0xff]  ;;  %v1111_v8 = vld [vmem:[%s4003_s2 + $0x160] sm:$0xff] }
 0x123   :  { %v965_v21 = vadd.f32 %v857_v18, %v671_v9  ;;  %v966_v22 = vadd.f32 %v857_v18, %v672_v16  ;;  %1873 = vmatprep.subr.mxu1 %v1052_v11  ;;  %1593 = vmatpush2.msra.mxu0 %v1015_v7  ;;  %v1112_v6 = vld [vmem:[%s4003_s2 + $0x168] sm:$0xff]  ;;  %v1115_v9 = vld [vmem:[%s4003_s2 + $0x180] sm:$0xff]  ;;  %v1114_v11 = vld [vmem:[%s4003_s2 + $0x178] sm:$0xff] }
 0x124   :  { %1874 = vmatpush1.msra.mxu1 %v1051_v10  ;;  %1595 = vmatmul.mubr.f32.vlgmr.msra.gmra.mxu0 %v1067_v14  ;;  %v1048_v28 = vmax.f32 %v964_v20, 0.0  ;;  %v1047_v29 = vmax.f32 %v963_v23, 0.0  ;;  %v1116_v7 = vld [vmem:[%s4003_s2 + $0x188] sm:$0xff]  ;;  %v1119_v10 = vld [vmem:[%s4003_s2 + $0x1a0] sm:$0xff]  ;;  %v1118_v13 = vld [vmem:[%s4003_s2 + $0x198] sm:$0xff] }
 0x125   :  { %v1049_v24 = vmax.f32 %v965_v21, 0.0  ;;  %v1050_v25 = vmax.f32 %v966_v22, 0.0  ;;  %1600 = vmatprep.mubr.f32.mxu0 %v1071_v19  ;;  %v1122_v15 = vld [vmem:[%s4003_s2 + $0x1b8] sm:$0xff]  ;;  %v1117_v16 = vld [vmem:[%s4003_s2 + $0x190] sm:$0xff]  ;;  %v1120_v18 = vld [vmem:[%s4003_s2 + $0x1a8] sm:$0xff] }
 0x126   :  { %v1121_v14 = vld [vmem:[%s4003_s2 + $0x1b0] sm:$0xff]  ;;  %v1124_v19 = vld [vmem:[%s4003_s2 + $0x1c8] sm:$0xff]  ;;  %v1123_v21 = vld [vmem:[%s4003_s2 + $0x1c0] sm:$0xff] }
 0x127   :  { %1875 = vmatprep.subr.mxu1 %v1050_v25  ;;  %v1125_v17 = vld [vmem:[%s4003_s2 + $0x1d0] sm:$0xff]  ;;  %v1128_v20 = vld [vmem:[%s4003_s2 + $0x1e8] sm:$0xff]  ;;  %v1127_v22 = vld [vmem:[%s4003_s2 + $0x1e0] sm:$0xff] }
 0x128   :  { %1876 = vmatpush1.msra.mxu1 %v1049_v24  ;;  %1601 = vmatmul.mubr.f32.gmra.mxu0 %v1070_v26  ;;  %v1131_v23 = vld [vmem:[%s4003_s2 + $0x200] sm:$0xff]  ;;  %v1126_v24 = vld [vmem:[%s4003_s2 + $0x1d8] sm:$0xff] }
 0x129   :  { %1877 = vmatprep.subr.mxu1 %v1048_v28  ;;  %1606 = vmatprep.mubr.f32.mxu0 %v1074_v27  ;;  %v1130_v25 = vld [vmem:[%s4003_s2 + $0x1f8] sm:$0xff]  ;;  %v1129_v27 = vld [vmem:[%s4003_s2 + $0x1f0] sm:$0xff] }
 0x12a   :  { %1878 = vmatpush1.msra.mxu1 %v1047_v29  ;;  %v1134_v26 = vld [vmem:[%s4003_s2 + $0x218] sm:$0xff]  ;;  %v1133_v28 = vld [vmem:[%s4003_s2 + $0x210] sm:$0xff] }
 0x12b   :  { %2253 = vmatmul.mubr.msk.f32.vlgmr.msra.gmra.mxu1 %vm1403_vm0, %v1069_v30  ;;  %v1137_v29 = vld [vmem:[%s4003_s2 + $0x230] sm:$0xff]  ;;  %v1132_v30 = vld [vmem:[%s4003_s2 + $0x208] sm:$0xff] }
 0x12c   :  { %1607 = vmatmul.mubr.f32.gmra.mxu0 %v1073_v31  ;;  %1917 = vmatprep.mubr.f32.mxu1 %v2300_v60  ;;  %v1136_v31 = vld [vmem:[%s4003_s2 + $0x228] sm:$0xff] }
 0x12d   :  { %1612 = vmatprep.mubr.f32.mxu0 %v1077_v32  ;;  %v1140_v32 = vld [vmem:[%s4003_s2 + $0x248] sm:$0xff] }
 0x12f   :  { %2254 = vmatmul.mubr.msk.f32.gmra.mxu1 %vm1403_vm0, %v1072_v33  ;;  %v1135_v33 = vld [vmem:[%s4003_s2 + $0x220] sm:$0xff] }
 0x130   :  { %1613 = vmatmul.mubr.f32.gmra.mxu0 %v1076_v34  ;;  %1923 = vmatprep.mubr.f32.mxu1 %v2300_v60  ;;  %v1139_v34 = vld [vmem:[%s4003_s2 + $0x240] sm:$0xff] }
 0x131   :  { %1618 = vmatprep.mubr.f32.mxu0 %v1080_v35  ;;  %v1143_v35 = vld [vmem:[%s4003_s2 + $0x260] sm:$0xff] }
 0x133   :  { %2255 = vmatmul.mubr.msk.f32.gmra.mxu1 %vm1403_vm0, %v1075_v36  ;;  %v1138_v36 = vld [vmem:[%s4003_s2 + $0x238] sm:$0xff] }
 0x134   :  { %1619 = vmatmul.mubr.f32.gmra.mxu0 %v1079_v12  ;;  %1929 = vmatprep.mubr.f32.mxu1 %v2300_v60  ;;  %v1142_v12 = vld [vmem:[%s4003_s2 + $0x258] sm:$0xff] }
 0x135   :  { %1624 = vmatprep.mubr.f32.mxu0 %v1083_v38  ;;  %v1146_v38 = vld [vmem:[%s4003_s2 + $0x278] sm:$0xff] }
 0x137   :  { %2256 = vmatmul.mubr.msk.f32.gmra.mxu1 %vm1403_vm0, %v1078_v39  ;;  %v1141_v39 = vld [vmem:[%s4003_s2 + $0x250] sm:$0xff] }
 0x138   :  { %1625 = vmatmul.mubr.f32.gmra.mxu0 %v1082_v40  ;;  %1935 = vmatprep.mubr.f32.mxu1 %v2300_v60  ;;  %v1145_v40 = vld [vmem:[%s4003_s2 + $0x270] sm:$0xff] }
 0x139   :  { %1630 = vmatprep.mubr.f32.mxu0 %v1086_v41  ;;  %v1149_v41 = vld [vmem:[%s4003_s2 + $0x290] sm:$0xff] }
 0x13b   :  { %2257 = vmatmul.mubr.msk.f32.gmra.mxu1 %vm1403_vm0, %v1081_v42  ;;  %v1144_v42 = vld [vmem:[%s4003_s2 + $0x268] sm:$0xff] }
 0x13c   :  { %1631 = vmatmul.mubr.f32.gmra.mxu0 %v1085_v45  ;;  %1941 = vmatprep.mubr.f32.mxu1 %v2300_v60  ;;  %v1148_v45 = vld [vmem:[%s4003_s2 + $0x288] sm:$0xff] }
 0x13d   :  { %1636 = vmatprep.mubr.f32.mxu0 %v1089_v46  ;;  %v1152_v46 = vld [vmem:[%s4003_s2 + $0x2a8] sm:$0xff] }
 0x13f   :  { %2258 = vmatmul.mubr.msk.f32.gmra.mxu1 %vm1403_vm0, %v1084_v37  ;;  %v1147_v37 = vld [vmem:[%s4003_s2 + $0x280] sm:$0xff] }
 0x140   :  { %1637 = vmatmul.mubr.f32.gmra.mxu0 %v1088_v43  ;;  %1947 = vmatprep.mubr.f32.mxu1 %v2300_v60  ;;  %v1151_v43 = vld [vmem:[%s4003_s2 + $0x2a0] sm:$0xff] }
 0x141   :  { %1642 = vmatprep.mubr.f32.mxu0 %v1092_v47  ;;  %v1155_v47 = vld [vmem:[%s4003_s2 + $0x2c0] sm:$0xff] }
 0x143   :  { %2259 = vmatmul.mubr.msk.f32.gmra.mxu1 %vm1403_vm0, %v1087_v48  ;;  %v1150_v48 = vld [vmem:[%s4003_s2 + $0x298] sm:$0xff] }
 0x144   :  { %1643 = vmatmul.mubr.f32.gmra.mxu0 %v1091_v49  ;;  %1953 = vmatprep.mubr.f32.mxu1 %v2300_v60  ;;  %v1154_v49 = vld [vmem:[%s4003_s2 + $0x2b8] sm:$0xff] }
 0x145   :  { %1648 = vmatprep.mubr.f32.mxu0 %v1095_v44  ;;  %v1158_v44 = vld [vmem:[%s4003_s2 + $0x2d8] sm:$0xff] }
 0x147   :  { %2260 = vmatmul.mubr.msk.f32.gmra.mxu1 %vm1403_vm0, %v1090_v50  ;;  %v1153_v50 = vld [vmem:[%s4003_s2 + $0x2b0] sm:$0xff] }
 0x148   :  { %1649 = vmatmul.mubr.f32.gmra.mxu0 %v1094_v51  ;;  %1959 = vmatprep.mubr.f32.mxu1 %v2300_v60  ;;  %v1157_v51 = vld [vmem:[%s4003_s2 + $0x2d0] sm:$0xff] }
 0x149   :  { %1654 = vmatprep.mubr.f32.mxu0 %v1098_v52  ;;  %v1161_v52 = vld [vmem:[%s4003_s2 + $0x2f0] sm:$0xff] }
 0x14b   :  { %2261 = vmatmul.mubr.msk.f32.gmra.mxu1 %vm1403_vm0, %v1093_v53  ;;  %v1156_v53 = vld [vmem:[%s4003_s2 + $0x2c8] sm:$0xff] }
 0x14c   :  { %1655 = vmatmul.mubr.f32.gmra.mxu0 %v1097_v4  ;;  %1965 = vmatprep.mubr.f32.mxu1 %v2300_v60  ;;  %v1160_v4 = vld [vmem:[%s4003_s2 + $0x2e8] sm:$0xff] }
 0x14d   :  { %1660 = vmatprep.mubr.f32.mxu0 %v1101_v54  ;;  %v1164_v54 = vld [vmem:[%s4003_s2 + $0x308] sm:$0xff] }
 0x14f   :  { %2262 = vmatmul.mubr.msk.f32.gmra.mxu1 %vm1403_vm0, %v1096_v55  ;;  %v1159_v55 = vld [vmem:[%s4003_s2 + $0x2e0] sm:$0xff] }
 0x150   :  { %1661 = vmatmul.mubr.f32.gmra.mxu0 %v1100_v56  ;;  %1971 = vmatprep.mubr.f32.mxu1 %v2300_v60  ;;  %v1163_v56 = vld [vmem:[%s4003_s2 + $0x300] sm:$0xff] }
 0x151   :  { %1666 = vmatprep.mubr.f32.mxu0 %v1104_v57  ;;  %v1167_v57 = vld [vmem:[%s4003_s2 + $0x320] sm:$0xff] }
 0x153   :  { %2263 = vmatmul.mubr.msk.f32.gmra.mxu1 %vm1403_vm0, %v1099_v58  ;;  %v1162_v58 = vld [vmem:[%s4003_s2 + $0x2f8] sm:$0xff] }
 0x154   :  { %1667 = vmatmul.mubr.f32.gmra.mxu0 %v1103_v59  ;;  %1977 = vmatprep.mubr.f32.mxu1 %v2300_v60  ;;  %v1166_v59 = vld [vmem:[%s4003_s2 + $0x318] sm:$0xff] }
 0x155   :  { %1672 = vmatprep.mubr.f32.mxu0 %v1107_v61  ;;  %v1170_v61 = vld [vmem:[%s4003_s2 + $0x338] sm:$0xff] }
 0x157   :  { %2264 = vmatmul.mubr.msk.f32.gmra.mxu1 %vm1403_vm0, %v1102_v62  ;;  %v1165_v62 = vld [vmem:[%s4003_s2 + $0x310] sm:$0xff] }
 0x158   :  { %1673 = vmatmul.mubr.f32.gmra.mxu0 %v1106_v63  ;;  %1983 = vmatprep.mubr.f32.mxu1 %v2300_v60  ;;  %v1169_v63 = vld [vmem:[%s4003_s2 + $0x330] sm:$0xff] }
 0x159   :  { %1678 = vmatprep.mubr.f32.mxu0 %v1110_v0  ;;  %v1173_v0 = vld [vmem:[%s4003_s2 + $0x350] sm:$0xff] }
 0x15b   :  { %2265 = vmatmul.mubr.msk.f32.gmra.mxu1 %vm1403_vm0, %v1105_v1  ;;  %v1168_v1 = vld [vmem:[%s4003_s2 + $0x328] sm:$0xff] }
 0x15c   :  { %1679 = vmatmul.mubr.f32.gmra.mxu0 %v1109_v2  ;;  %1989 = vmatprep.mubr.f32.mxu1 %v2300_v60  ;;  %v1172_v2 = vld [vmem:[%s4003_s2 + $0x348] sm:$0xff] }
 0x15d   :  { %1684 = vmatprep.mubr.f32.mxu0 %v1113_v3  ;;  %v1176_v3 = vld [vmem:[%s4003_s2 + $0x368] sm:$0xff] }
 0x15f   :  { %2266 = vmatmul.mubr.msk.f32.gmra.mxu1 %vm1403_vm0, %v1108_v5  ;;  %v1171_v5 = vld [vmem:[%s4003_s2 + $0x340] sm:$0xff] }
 0x160   :  { %1685 = vmatmul.mubr.f32.gmra.mxu0 %v1112_v6  ;;  %1995 = vmatprep.mubr.f32.mxu1 %v2300_v60  ;;  %v1175_v6 = vld [vmem:[%s4003_s2 + $0x360] sm:$0xff] }
 0x161   :  { %1690 = vmatprep.mubr.f32.mxu0 %v1116_v7  ;;  %v1179_v7 = vld [vmem:[%s4003_s2 + $0x380] sm:$0xff] }
 0x163   :  { %2267 = vmatmul.mubr.msk.f32.gmra.mxu1 %vm1403_vm0, %v1111_v8  ;;  %v1174_v8 = vld [vmem:[%s4003_s2 + $0x358] sm:$0xff] }
 0x164   :  { %1691 = vmatmul.mubr.f32.gmra.mxu0 %v1115_v9  ;;  %2001 = vmatprep.mubr.f32.mxu1 %v2300_v60  ;;  %v1178_v9 = vld [vmem:[%s4003_s2 + $0x378] sm:$0xff] }
 0x165   :  { %1696 = vmatprep.mubr.f32.mxu0 %v1119_v10  ;;  %v1182_v10 = vld [vmem:[%s4003_s2 + $0x398] sm:$0xff] }
 0x167   :  { %2268 = vmatmul.mubr.msk.f32.gmra.mxu1 %vm1403_vm0, %v1114_v11  ;;  %v1177_v11 = vld [vmem:[%s4003_s2 + $0x370] sm:$0xff] }
 0x168   :  { %1697 = vmatmul.mubr.f32.gmra.mxu0 %v1118_v13  ;;  %2007 = vmatprep.mubr.f32.mxu1 %v2300_v60  ;;  %v1181_v13 = vld [vmem:[%s4003_s2 + $0x390] sm:$0xff] }
 0x169   :  { %1702 = vmatprep.mubr.f32.mxu0 %v1122_v15  ;;  %v1185_v15 = vld [vmem:[%s4003_s2 + $0x3b0] sm:$0xff] }
 0x16b   :  { %2269 = vmatmul.mubr.msk.f32.gmra.mxu1 %vm1403_vm0, %v1117_v16  ;;  %v1180_v16 = vld [vmem:[%s4003_s2 + $0x388] sm:$0xff] }
 0x16c   :  { %1703 = vmatmul.mubr.f32.gmra.mxu0 %v1121_v14  ;;  %2013 = vmatprep.mubr.f32.mxu1 %v2300_v60  ;;  %v1184_v14 = vld [vmem:[%s4003_s2 + $0x3a8] sm:$0xff] }
 0x16d   :  { %1708 = vmatprep.mubr.f32.mxu0 %v1125_v17  ;;  %v1188_v17 = vld [vmem:[%s4003_s2 + $0x3c8] sm:$0xff] }
 0x16f   :  { %2270 = vmatmul.mubr.msk.f32.gmra.mxu1 %vm1403_vm0, %v1120_v18  ;;  %v1183_v18 = vld [vmem:[%s4003_s2 + $0x3a0] sm:$0xff] }
 0x170   :  { %1709 = vmatmul.mubr.f32.gmra.mxu0 %v1124_v19  ;;  %2019 = vmatprep.mubr.f32.mxu1 %v2300_v60  ;;  %v1187_v19 = vld [vmem:[%s4003_s2 + $0x3c0] sm:$0xff] }
 0x171   :  { %1714 = vmatprep.mubr.f32.mxu0 %v1128_v20  ;;  %v1191_v20 = vld [vmem:[%s4003_s2 + $0x3e0] sm:$0xff] }
 0x173   :  { %2271 = vmatmul.mubr.msk.f32.gmra.mxu1 %vm1403_vm0, %v1123_v21  ;;  %v1186_v21 = vld [vmem:[%s4003_s2 + $0x3b8] sm:$0xff] }
 0x174   :  { %1715 = vmatmul.mubr.f32.gmra.mxu0 %v1127_v22  ;;  %2025 = vmatprep.mubr.f32.mxu1 %v2300_v60  ;;  %v1190_v22 = vld [vmem:[%s4003_s2 + $0x3d8] sm:$0xff] }
 0x175   :  { %1720 = vmatprep.mubr.f32.mxu0 %v1131_v23  ;;  %v1189_v23 = vld [vmem:[%s4003_s2 + $0x3d0] sm:$0xff] }
 0x177   :  { %2272 = vmatmul.mubr.msk.f32.gmra.mxu1 %vm1403_vm0, %v1126_v24  ;;  %v1192_v24 = vld [vmem:[%s4003_s2 + $0x3e8] sm:$0xff] }
 0x178   :  { %1721 = vmatmul.mubr.f32.gmra.mxu0 %v1130_v25  ;;  %2031 = vmatprep.mubr.f32.mxu1 %v2300_v60 }
 0x179   :  { %1726 = vmatprep.mubr.f32.mxu0 %v1134_v26 }
 0x17b   :  { %2273 = vmatmul.mubr.msk.f32.gmra.mxu1 %vm1403_vm0, %v1129_v27 }
 0x17c   :  { %1727 = vmatmul.mubr.f32.gmra.mxu0 %v1133_v28  ;;  %2037 = vmatprep.mubr.f32.mxu1 %v2300_v60  ;;  %v1196_v28 = vpop.permute.xlu0 %1195 }
 0x17d   :  { %1732 = vmatprep.mubr.f32.mxu0 %v1137_v29 }
 0x17f   :  { %2274 = vmatmul.mubr.msk.f32.gmra.mxu1 %vm1403_vm0, %v1132_v30 }
 0x180   :  { %1733 = vmatmul.mubr.f32.gmra.mxu0 %v1136_v31  ;;  %2043 = vmatprep.mubr.f32.mxu1 %v2300_v60 }
 0x181   :  { %1738 = vmatprep.mubr.f32.mxu0 %v1140_v32 }
 0x183   :  { %2275 = vmatmul.mubr.msk.f32.gmra.mxu1 %vm1403_vm0, %v1135_v33 }
 0x184   :  { %1739 = vmatmul.mubr.f32.gmra.mxu0 %v1139_v34  ;;  %2049 = vmatprep.mubr.f32.mxu1 %v2300_v60 }
 0x185   :  { %1744 = vmatprep.mubr.f32.mxu0 %v1143_v35  ;;  %v1201_v35 = vpop.permute.xlu1 %1200 }
 0x187   :  { %2276 = vmatmul.mubr.msk.f32.gmra.mxu1 %vm1403_vm0, %v1138_v36 }
 0x188   :  { %1745 = vmatmul.mubr.f32.gmra.mxu0 %v1142_v12  ;;  %2055 = vmatprep.mubr.f32.mxu1 %v2300_v60 }
 0x189   :  { %1750 = vmatprep.mubr.f32.mxu0 %v1146_v38 }
 0x18b   :  { %2277 = vmatmul.mubr.msk.f32.gmra.mxu1 %vm1403_vm0, %v1141_v39 }
 0x18c   :  { %1751 = vmatmul.mubr.f32.gmra.mxu0 %v1145_v40  ;;  %2061 = vmatprep.mubr.f32.mxu1 %v2300_v60 }
 0x18d   :  { %1756 = vmatprep.mubr.f32.mxu0 %v1149_v41 }
 0x18f   :  { %2278 = vmatmul.mubr.msk.f32.gmra.mxu1 %vm1403_vm0, %v1144_v42 }
 0x190   :  { %1757 = vmatmul.mubr.f32.gmra.mxu0 %v1148_v45  ;;  %2067 = vmatprep.mubr.f32.mxu1 %v2300_v60  ;;  %v1206_v45 = vpop.permute.xlu0 %1205 }
 0x191   :  { %1762 = vmatprep.mubr.f32.mxu0 %v1152_v46 }
 0x193   :  { %2279 = vmatmul.mubr.msk.f32.gmra.mxu1 %vm1403_vm0, %v1147_v37 }
 0x194   :  { %1763 = vmatmul.mubr.f32.gmra.mxu0 %v1151_v43  ;;  %2073 = vmatprep.mubr.f32.mxu1 %v2300_v60 }
 0x195   :  { %1768 = vmatprep.mubr.f32.mxu0 %v1155_v47 }
 0x197   :  { %2280 = vmatmul.mubr.msk.f32.gmra.mxu1 %vm1403_vm0, %v1150_v48 }
 0x198   :  { %1769 = vmatmul.mubr.f32.gmra.mxu0 %v1154_v49  ;;  %2079 = vmatprep.mubr.f32.mxu1 %v2300_v60 }
 0x199   :  { %1774 = vmatprep.mubr.f32.mxu0 %v1158_v44 }
 0x19b   :  { %2281 = vmatmul.mubr.msk.f32.gmra.mxu1 %vm1403_vm0, %v1153_v50 }
 0x19c   :  { %1775 = vmatmul.mubr.f32.gmra.mxu0 %v1157_v51  ;;  %2085 = vmatprep.mubr.f32.mxu1 %v2300_v60  ;;  %v1211_v51 = vpop.permute.xlu1 %1210 }
 0x19d   :  { %1780 = vmatprep.mubr.f32.mxu0 %v1161_v52 }
 0x19f   :  { %2282 = vmatmul.mubr.msk.f32.gmra.mxu1 %vm1403_vm0, %v1156_v53 }
 0x1a0   :  { %1781 = vmatmul.mubr.f32.gmra.mxu0 %v1160_v4  ;;  %2091 = vmatprep.mubr.f32.mxu1 %v2300_v60 }
 0x1a1   :  { %1786 = vmatprep.mubr.f32.mxu0 %v1164_v54 }
 0x1a3   :  { %2283 = vmatmul.mubr.msk.f32.gmra.mxu1 %vm1403_vm0, %v1159_v55 }
 0x1a4   :  { %1787 = vmatmul.mubr.f32.gmra.mxu0 %v1163_v56  ;;  %2097 = vmatprep.mubr.f32.mxu1 %v2300_v60 }
 0x1a5   :  { %1792 = vmatprep.mubr.f32.mxu0 %v1167_v57 }
 0x1a7   :  { %2284 = vmatmul.mubr.msk.f32.gmra.mxu1 %vm1403_vm0, %v1162_v58 }
 0x1a8   :  { %1793 = vmatmul.mubr.f32.gmra.mxu0 %v1166_v59  ;;  %2103 = vmatprep.mubr.f32.mxu1 %v2300_v60  ;;  %v1216_v59 = vpop.permute.xlu0 %1215 }
 0x1a9   :  { %1798 = vmatprep.mubr.f32.mxu0 %v1170_v61 }
 0x1ab   :  { %2285 = vmatmul.mubr.msk.f32.gmra.mxu1 %vm1403_vm0, %v1165_v62 }
 0x1ac   :  { %1799 = vmatmul.mubr.f32.gmra.mxu0 %v1169_v63  ;;  %2109 = vmatprep.mubr.f32.mxu1 %v2300_v60 }
 0x1ad   :  { %1804 = vmatprep.mubr.f32.mxu0 %v1173_v0 }
 0x1af   :  { %2286 = vmatmul.mubr.msk.f32.gmra.mxu1 %vm1403_vm0, %v1168_v1 }
 0x1b0   :  { %1805 = vmatmul.mubr.f32.gmra.mxu0 %v1172_v2  ;;  %2115 = vmatprep.mubr.f32.mxu1 %v2300_v60 }
 0x1b1   :  { %1810 = vmatprep.mubr.f32.mxu0 %v1176_v3 }
 0x1b3   :  { %2287 = vmatmul.mubr.msk.f32.gmra.mxu1 %vm1403_vm0, %v1171_v5 }
 0x1b4   :  { %1811 = vmatmul.mubr.f32.gmra.mxu0 %v1175_v6  ;;  %2121 = vmatprep.mubr.f32.mxu1 %v2300_v60  ;;  %v1221_v6 = vpop.permute.xlu1 %1220 }
 0x1b5   :  { %1816 = vmatprep.mubr.f32.mxu0 %v1179_v7 }
 0x1b7   :  { %2288 = vmatmul.mubr.msk.f32.gmra.mxu1 %vm1403_vm0, %v1174_v8 }
 0x1b8   :  { %1817 = vmatmul.mubr.f32.gmra.mxu0 %v1178_v9  ;;  %2127 = vmatprep.mubr.f32.mxu1 %v2300_v60 }
 0x1b9   :  { %1822 = vmatprep.mubr.f32.mxu0 %v1182_v10 }
 0x1bb   :  { %2289 = vmatmul.mubr.msk.f32.gmra.mxu1 %vm1403_vm0, %v1177_v11 }
 0x1bc   :  { %1823 = vmatmul.mubr.f32.gmra.mxu0 %v1181_v13  ;;  %2133 = vmatprep.mubr.f32.mxu1 %v2300_v60 }
 0x1bd   :  { %1828 = vmatprep.mubr.f32.mxu0 %v1185_v15 }
 0x1bf   :  { %2290 = vmatmul.mubr.msk.f32.gmra.mxu1 %vm1403_vm0, %v1180_v16 }
 0x1c0   :  { %1829 = vmatmul.mubr.f32.gmra.mxu0 %v1184_v14  ;;  %2139 = vmatprep.mubr.f32.mxu1 %v2300_v60  ;;  %v1226_v14 = vpop.permute.xlu0 %1225 }
 0x1c1   :  { %1834 = vmatprep.mubr.f32.mxu0 %v1188_v17 }
 0x1c3   :  { %2291 = vmatmul.mubr.msk.f32.gmra.mxu1 %vm1403_vm0, %v1183_v18 }
 0x1c4   :  { %1835 = vmatmul.mubr.f32.gmra.mxu0 %v1187_v19  ;;  %2145 = vmatprep.mubr.f32.mxu1 %v2300_v60 }
 0x1c5   :  { %1840 = vmatprep.mubr.f32.mxu0 %v1191_v20 }
 0x1c7   :  { %2292 = vmatmul.mubr.msk.f32.gmra.mxu1 %vm1403_vm0, %v1186_v21 }
 0x1c8   :  { %1841 = vmatmul.mubr.f32.gmra.mxu0 %v1190_v22  ;;  %2151 = vmatprep.mubr.f32.mxu1 %v2300_v60 }
 0x1cb   :  { %2293 = vmatmul.mubr.msk.f32.gmra.mxu1 %vm1403_vm0, %v1189_v23 }
 0x1cc   :  { %2157 = vmatprep.mubr.f32.mxu1 %v2300_v60 }
 0x1cf   :  { %2294 = vmatmul.mubr.msk.f32.gmra.mxu1 %vm1403_vm0, %v1192_v24 }
 0x1e4   :  { %v1596_v25 = vpop.f32.mrf.mxu0 }
 0x1e5   :  { %v1597_v29 = vadd.f32 %v1596_v25, %v1196_v28  ;;  %v1231_v25 = vpop.permute.xlu1 %1230 }
 0x1e6   :  { %v1598_v26 = vpop.f32.mrf.mxu0 }
 0x1e7   :  { %v1599_v32 = vadd.f32 %v1598_v26, %v1196_v28 }
 0x1e8   :  { %v1602_v27 = vpop.f32.mrf.mxu0 }
 0x1e9   :  { %v1603_v60 = vadd.f32 %v1602_v27, %v1201_v35 }
 0x1ea   :  { %v1604_v30 = vpop.f32.mrf.mxu0 }
 0x1eb   :  { %v1913_v31 = vpop.f32.mrf.mxu1  ;;  %v1605_v40 = vadd.f32 %v1604_v30, %v1201_v35 }
 0x1ec   :  { %v1914_v33 = vadd.f32 %v1913_v31, %v1597_v29  ;;  %v1608_v34 = vpop.f32.mrf.mxu0 }
 0x1ed   :  { %v1915_v36 = vpop.f32.mrf.mxu1  ;;  %v1609_v37 = vadd.f32 %v1608_v34, %v1206_v45  ;;  %v1236_v34 = vpop.permute.xlu0 %1235 }
 0x1ee   :  { %2164 = vst [vmem:[%s4004_s4] sm:$0xff] %v1914_v33  ;;  %v1916_v12 = vadd.f32 %v1915_v36, %v1599_v32  ;;  %v1610_v38 = vpop.f32.mrf.mxu0 }
 0x1ef   :  { %v1919_v39 = vpop.f32.mrf.mxu1  ;;  %v1611_v49 = vadd.f32 %v1610_v38, %v1206_v45 }
 0x1f0   :  { %2166 = vst.msk [vmem:[%s4004_s4 + $0x8] sm:$0xff] %vm2165_vm1, %v1916_v12  ;;  %v1920_v41 = vadd.f32 %v1919_v39, %v1603_v60  ;;  %v1614_v42 = vpop.f32.mrf.mxu0 }
 0x1f1   :  { %v1921_v46 = vpop.f32.mrf.mxu1  ;;  %v1615_v53 = vadd.f32 %v1614_v42, %v1211_v51  ;;  %v1241_v42 = vpop.permute.xlu1 %1240 }
 0x1f2   :  { %2167 = vst [vmem:[%s4004_s4 + $0x10] sm:$0xff] %v1920_v41  ;;  %v1922_v43 = vadd.f32 %v1921_v46, %v1605_v40  ;;  %v1616_v47 = vpop.f32.mrf.mxu0 }
 0x1f3   :  { %v1925_v48 = vpop.f32.mrf.mxu1  ;;  %v1617_v56 = vadd.f32 %v1616_v47, %v1211_v51 }
 0x1f4   :  { %2168 = vst.msk [vmem:[%s4004_s4 + $0x18] sm:$0xff] %vm2165_vm1, %v1922_v43  ;;  %v1926_v44 = vadd.f32 %v1925_v48, %v1609_v37  ;;  %v1620_v50 = vpop.f32.mrf.mxu0 }
 0x1f5   :  { %v1927_v52 = vpop.f32.mrf.mxu1  ;;  %v1621_v62 = vadd.f32 %v1620_v50, %v1216_v59  ;;  %v1246_v50 = vpop.permute.xlu0 %1245 }
 0x1f6   :  { %2169 = vst [vmem:[%s4004_s4 + $0x20] sm:$0xff] %v1926_v44  ;;  %v1928_v4 = vadd.f32 %v1927_v52, %v1611_v49  ;;  %v1622_v54 = vpop.f32.mrf.mxu0 }
 0x1f7   :  { %v1931_v55 = vpop.f32.mrf.mxu1  ;;  %v1623_v2 = vadd.f32 %v1622_v54, %v1216_v59 }
 0x1f8   :  { %2170 = vst.msk [vmem:[%s4004_s4 + $0x28] sm:$0xff] %vm2165_vm1, %v1928_v4  ;;  %v1932_v57 = vadd.f32 %v1931_v55, %v1615_v53  ;;  %v1626_v58 = vpop.f32.mrf.mxu0 }
 0x1f9   :  { %v1933_v61 = vpop.f32.mrf.mxu1  ;;  %v1627_v8 = vadd.f32 %v1626_v58, %v1221_v6  ;;  %v1251_v58 = vpop.permute.xlu1 %1250 }
 0x1fa   :  { %2171 = vst [vmem:[%s4004_s4 + $0x30] sm:$0xff] %v1932_v57  ;;  %v1934_v63 = vadd.f32 %v1933_v61, %v1617_v56  ;;  %v1628_v0 = vpop.f32.mrf.mxu0 }
 0x1fb   :  { %v1937_v1 = vpop.f32.mrf.mxu1  ;;  %v1629_v13 = vadd.f32 %v1628_v0, %v1221_v6 }
 0x1fc   :  { %2172 = vst.msk [vmem:[%s4004_s4 + $0x38] sm:$0xff] %vm2165_vm1, %v1934_v63  ;;  %v1938_v3 = vadd.f32 %v1937_v1, %v1621_v62  ;;  %v1632_v5 = vpop.f32.mrf.mxu0 }
 0x1fd   :  { %v1939_v7 = vpop.f32.mrf.mxu1  ;;  %v1633_v18 = vadd.f32 %v1632_v5, %v1226_v14  ;;  %v1256_v5 = vpop.permute.xlu0 %1255 }
 0x1fe   :  { %2173 = vst [vmem:[%s4004_s4 + $0x40] sm:$0xff] %v1938_v3  ;;  %v1940_v9 = vadd.f32 %v1939_v7, %v1623_v2  ;;  %v1634_v10 = vpop.f32.mrf.mxu0 }
 0x1ff   :  { %v1943_v11 = vpop.f32.mrf.mxu1  ;;  %v1635_v22 = vadd.f32 %v1634_v10, %v1226_v14 }
 0x200   :  { %2174 = vst.msk [vmem:[%s4004_s4 + $0x48] sm:$0xff] %vm2165_vm1, %v1940_v9  ;;  %v1944_v15 = vadd.f32 %v1943_v11, %v1627_v8  ;;  %v1638_v16 = vpop.f32.mrf.mxu0 }
 0x201   :  { %v1945_v17 = vpop.f32.mrf.mxu1  ;;  %v1639_v27 = vadd.f32 %v1638_v16, %v1231_v25  ;;  %v1261_v16 = vpop.permute.xlu1 %1260 }
 0x202   :  { %2175 = vst [vmem:[%s4004_s4 + $0x50] sm:$0xff] %v1944_v15  ;;  %v1946_v19 = vadd.f32 %v1945_v17, %v1629_v13  ;;  %v1640_v20 = vpop.f32.mrf.mxu0 }
 0x203   :  { %v1949_v21 = vpop.f32.mrf.mxu1  ;;  %v1641_v31 = vadd.f32 %v1640_v20, %v1231_v25 }
 0x204   :  { %2176 = vst.msk [vmem:[%s4004_s4 + $0x58] sm:$0xff] %vm2165_vm1, %v1946_v19  ;;  %v1950_v23 = vadd.f32 %v1949_v21, %v1633_v18  ;;  %v1644_v24 = vpop.f32.mrf.mxu0 }
 0x205   :  { %v1951_v26 = vpop.f32.mrf.mxu1  ;;  %v1645_v36 = vadd.f32 %v1644_v24, %v1236_v34  ;;  %v1266_v24 = vpop.permute.xlu0 %1265 }
 0x206   :  { %2177 = vst [vmem:[%s4004_s4 + $0x60] sm:$0xff] %v1950_v23  ;;  %v1952_v28 = vadd.f32 %v1951_v26, %v1635_v22  ;;  %v1646_v29 = vpop.f32.mrf.mxu0 }
 0x207   :  { %v1955_v30 = vpop.f32.mrf.mxu1  ;;  %v1647_v39 = vadd.f32 %v1646_v29, %v1236_v34 }
 0x208   :  { %2178 = vst.msk [vmem:[%s4004_s4 + $0x68] sm:$0xff] %vm2165_vm1, %v1952_v28  ;;  %v1956_v32 = vadd.f32 %v1955_v30, %v1639_v27  ;;  %v1650_v33 = vpop.f32.mrf.mxu0 }
 0x209   :  { %v1957_v35 = vpop.f32.mrf.mxu1  ;;  %v1651_v46 = vadd.f32 %v1650_v33, %v1241_v42  ;;  %v1271_v33 = vpop.permute.xlu1 %1270 }
 0x20a   :  { %2179 = vst [vmem:[%s4004_s4 + $0x70] sm:$0xff] %v1956_v32  ;;  %v1958_v60 = vadd.f32 %v1957_v35, %v1641_v31  ;;  %v1652_v12 = vpop.f32.mrf.mxu0 }
 0x20b   :  { %v1961_v38 = vpop.f32.mrf.mxu1  ;;  %v1653_v48 = vadd.f32 %v1652_v12, %v1241_v42 }
 0x20c   :  { %2180 = vst.msk [vmem:[%s4004_s4 + $0x78] sm:$0xff] %vm2165_vm1, %v1958_v60  ;;  %v1962_v40 = vadd.f32 %v1961_v38, %v1645_v36  ;;  %v1656_v41 = vpop.f32.mrf.mxu0 }
 0x20d   :  { %v1963_v45 = vpop.f32.mrf.mxu1  ;;  %v1657_v52 = vadd.f32 %v1656_v41, %v1246_v50  ;;  %v1276_v41 = vpop.permute.xlu0 %1275 }
 0x20e   :  { %2181 = vst [vmem:[%s4004_s4 + $0x80] sm:$0xff] %v1962_v40  ;;  %v1964_v37 = vadd.f32 %v1963_v45, %v1647_v39  ;;  %v1658_v43 = vpop.f32.mrf.mxu0 }
 0x20f   :  { %v1967_v47 = vpop.f32.mrf.mxu1  ;;  %v1659_v55 = vadd.f32 %v1658_v43, %v1246_v50 }
 0x210   :  { %2182 = vst.msk [vmem:[%s4004_s4 + $0x88] sm:$0xff] %vm2165_vm1, %v1964_v37  ;;  %v1968_v49 = vadd.f32 %v1967_v47, %v1651_v46  ;;  %v1662_v44 = vpop.f32.mrf.mxu0 }
 0x211   :  { %v1969_v51 = vpop.f32.mrf.mxu1  ;;  %v1663_v61 = vadd.f32 %v1662_v44, %v1251_v58  ;;  %v1281_v44 = vpop.permute.xlu1 %1280 }
 0x212   :  { %2183 = vst [vmem:[%s4004_s4 + $0x90] sm:$0xff] %v1968_v49  ;;  %v1970_v53 = vadd.f32 %v1969_v51, %v1653_v48  ;;  %v1664_v4 = vpop.f32.mrf.mxu0 }
 0x213   :  { %v1973_v54 = vpop.f32.mrf.mxu1  ;;  %v1665_v1 = vadd.f32 %v1664_v4, %v1251_v58 }
 0x214   :  { %2184 = vst.msk [vmem:[%s4004_s4 + $0x98] sm:$0xff] %vm2165_vm1, %v1970_v53  ;;  %v1974_v56 = vadd.f32 %v1973_v54, %v1657_v52  ;;  %v1668_v57 = vpop.f32.mrf.mxu0 }
 0x215   :  { %v1975_v59 = vpop.f32.mrf.mxu1  ;;  %v1669_v7 = vadd.f32 %v1668_v57, %v1256_v5  ;;  %v1286_v57 = vpop.permute.xlu0 %1285 }
 0x216   :  { %2185 = vst [vmem:[%s4004_s4 + $0xa0] sm:$0xff] %v1974_v56  ;;  %v1976_v62 = vadd.f32 %v1975_v59, %v1659_v55  ;;  %v1670_v63 = vpop.f32.mrf.mxu0 }
 0x217   :  { %v1979_v0 = vpop.f32.mrf.mxu1  ;;  %v1671_v11 = vadd.f32 %v1670_v63, %v1256_v5 }
 0x218   :  { %2186 = vst.msk [vmem:[%s4004_s4 + $0xa8] sm:$0xff] %vm2165_vm1, %v1976_v62  ;;  %v1980_v2 = vadd.f32 %v1979_v0, %v1663_v61  ;;  %v1674_v3 = vpop.f32.mrf.mxu0 }
 0x219   :  { %v1981_v6 = vpop.f32.mrf.mxu1  ;;  %v1675_v17 = vadd.f32 %v1674_v3, %v1261_v16  ;;  %v1291_v3 = vpop.permute.xlu1 %1290 }
 0x21a   :  { %2187 = vst [vmem:[%s4004_s4 + $0xb0] sm:$0xff] %v1980_v2  ;;  %v1982_v8 = vadd.f32 %v1981_v6, %v1665_v1  ;;  %v1676_v9 = vpop.f32.mrf.mxu0 }
 0x21b   :  { %v1985_v10 = vpop.f32.mrf.mxu1  ;;  %v1677_v21 = vadd.f32 %v1676_v9, %v1261_v16 }
 0x21c   :  { %2188 = vst.msk [vmem:[%s4004_s4 + $0xb8] sm:$0xff] %vm2165_vm1, %v1982_v8  ;;  %v1986_v13 = vadd.f32 %v1985_v10, %v1669_v7  ;;  %v1680_v15 = vpop.f32.mrf.mxu0 }
 0x21d   :  { %v1987_v14 = vpop.f32.mrf.mxu1  ;;  %v1681_v26 = vadd.f32 %v1680_v15, %v1266_v24  ;;  %v1296_v15 = vpop.permute.xlu0 %1295 }
 0x21e   :  { %2189 = vst [vmem:[%s4004_s4 + $0xc0] sm:$0xff] %v1986_v13  ;;  %v1988_v18 = vadd.f32 %v1987_v14, %v1671_v11  ;;  %v1682_v19 = vpop.f32.mrf.mxu0 }
 0x21f   :  { %v1991_v20 = vpop.f32.mrf.mxu1  ;;  %v1683_v30 = vadd.f32 %v1682_v19, %v1266_v24 }
 0x220   :  { %2190 = vst.msk [vmem:[%s4004_s4 + $0xc8] sm:$0xff] %vm2165_vm1, %v1988_v18  ;;  %v1992_v22 = vadd.f32 %v1991_v20, %v1675_v17  ;;  %v1686_v23 = vpop.f32.mrf.mxu0 }
 0x221   :  { %v1993_v25 = vpop.f32.mrf.mxu1  ;;  %v1687_v35 = vadd.f32 %v1686_v23, %v1271_v33  ;;  %v1301_v23 = vpop.permute.xlu1 %1300 }
 0x222   :  { %2191 = vst [vmem:[%s4004_s4 + $0xd0] sm:$0xff] %v1992_v22  ;;  %v1994_v27 = vadd.f32 %v1993_v25, %v1677_v21  ;;  %v1688_v28 = vpop.f32.mrf.mxu0 }
 0x223   :  { %v1997_v29 = vpop.f32.mrf.mxu1  ;;  %v1689_v38 = vadd.f32 %v1688_v28, %v1271_v33 }
 0x224   :  { %2192 = vst.msk [vmem:[%s4004_s4 + $0xd8] sm:$0xff] %vm2165_vm1, %v1994_v27  ;;  %v1998_v31 = vadd.f32 %v1997_v29, %v1681_v26  ;;  %v1692_v32 = vpop.f32.mrf.mxu0 }
 0x225   :  { %v1999_v34 = vpop.f32.mrf.mxu1  ;;  %v1693_v45 = vadd.f32 %v1692_v32, %v1276_v41  ;;  %v1306_v32 = vpop.permute.xlu0 %1305 }
 0x226   :  { %2193 = vst [vmem:[%s4004_s4 + $0xe0] sm:$0xff] %v1998_v31  ;;  %v2000_v36 = vadd.f32 %v1999_v34, %v1683_v30  ;;  %v1694_v60 = vpop.f32.mrf.mxu0 }
 0x227   :  { %v2003_v12 = vpop.f32.mrf.mxu1  ;;  %v1695_v47 = vadd.f32 %v1694_v60, %v1276_v41 }
 0x228   :  { %2194 = vst.msk [vmem:[%s4004_s4 + $0xe8] sm:$0xff] %vm2165_vm1, %v2000_v36  ;;  %v2004_v39 = vadd.f32 %v2003_v12, %v1687_v35  ;;  %v1698_v40 = vpop.f32.mrf.mxu0 }
 0x229   :  { %v2005_v42 = vpop.f32.mrf.mxu1  ;;  %v1699_v51 = vadd.f32 %v1698_v40, %v1281_v44  ;;  %v1311_v40 = vpop.permute.xlu1 %1310 }
 0x22a   :  { %2195 = vst [vmem:[%s4004_s4 + $0xf0] sm:$0xff] %v2004_v39  ;;  %v2006_v46 = vadd.f32 %v2005_v42, %v1689_v38  ;;  %v1700_v37 = vpop.f32.mrf.mxu0 }
 0x22b   :  { %v2009_v43 = vpop.f32.mrf.mxu1  ;;  %v1701_v54 = vadd.f32 %v1700_v37, %v1281_v44 }
 0x22c   :  { %2196 = vst.msk [vmem:[%s4004_s4 + $0xf8] sm:$0xff] %vm2165_vm1, %v2006_v46  ;;  %v2010_v48 = vadd.f32 %v2009_v43, %v1693_v45  ;;  %v1704_v49 = vpop.f32.mrf.mxu0 }
 0x22d   :  { %v2011_v50 = vpop.f32.mrf.mxu1  ;;  %v1705_v59 = vadd.f32 %v1704_v49, %v1286_v57  ;;  %v1316_v49 = vpop.permute.xlu0 %1315 }
 0x22e   :  { %2197 = vst [vmem:[%s4004_s4 + $0x100] sm:$0xff] %v2010_v48  ;;  %v2012_v52 = vadd.f32 %v2011_v50, %v1695_v47  ;;  %v1706_v53 = vpop.f32.mrf.mxu0 }
 0x22f   :  { %v2015_v4 = vpop.f32.mrf.mxu1  ;;  %v1707_v0 = vadd.f32 %v1706_v53, %v1286_v57 }
 0x230   :  { %2198 = vst.msk [vmem:[%s4004_s4 + $0x108] sm:$0xff] %vm2165_vm1, %v2012_v52  ;;  %v2016_v55 = vadd.f32 %v2015_v4, %v1699_v51  ;;  %v1710_v56 = vpop.f32.mrf.mxu0 }
 0x231   :  { %v2017_v58 = vpop.f32.mrf.mxu1  ;;  %v1711_v6 = vadd.f32 %v1710_v56, %v1291_v3  ;;  %v1321_v56 = vpop.permute.xlu1 %1320 }
 0x232   :  { %2199 = vst [vmem:[%s4004_s4 + $0x110] sm:$0xff] %v2016_v55  ;;  %v2018_v61 = vadd.f32 %v2017_v58, %v1701_v54  ;;  %v1712_v62 = vpop.f32.mrf.mxu0 }
 0x233   :  { %v2021_v63 = vpop.f32.mrf.mxu1  ;;  %v1713_v10 = vadd.f32 %v1712_v62, %v1291_v3 }
 0x234   :  { %2200 = vst.msk [vmem:[%s4004_s4 + $0x118] sm:$0xff] %vm2165_vm1, %v2018_v61  ;;  %v2022_v1 = vadd.f32 %v2021_v63, %v1705_v59  ;;  %v1716_v2 = vpop.f32.mrf.mxu0 }
 0x235   :  { %v2023_v5 = vpop.f32.mrf.mxu1  ;;  %v1717_v14 = vadd.f32 %v1716_v2, %v1296_v15  ;;  %v1326_v2 = vpop.permute.xlu0 %1325 }
 0x236   :  { %2201 = vst [vmem:[%s4004_s4 + $0x120] sm:$0xff] %v2022_v1  ;;  %v2024_v7 = vadd.f32 %v2023_v5, %v1707_v0  ;;  %v1718_v8 = vpop.f32.mrf.mxu0 }
 0x237   :  { %v2027_v9 = vpop.f32.mrf.mxu1  ;;  %v1719_v20 = vadd.f32 %v1718_v8, %v1296_v15 }
 0x238   :  { %2202 = vst.msk [vmem:[%s4004_s4 + $0x128] sm:$0xff] %vm2165_vm1, %v2024_v7  ;;  %v2028_v11 = vadd.f32 %v2027_v9, %v1711_v6  ;;  %v1722_v13 = vpop.f32.mrf.mxu0 }
 0x239   :  { %v2029_v16 = vpop.f32.mrf.mxu1  ;;  %v1723_v25 = vadd.f32 %v1722_v13, %v1301_v23  ;;  %v1331_v13 = vpop.permute.xlu1 %1330 }
 0x23a   :  { %2203 = vst [vmem:[%s4004_s4 + $0x130] sm:$0xff] %v2028_v11  ;;  %v2030_v17 = vadd.f32 %v2029_v16, %v1713_v10  ;;  %v1724_v18 = vpop.f32.mrf.mxu0 }
 0x23b   :  { %v2033_v19 = vpop.f32.mrf.mxu1  ;;  %v1725_v29 = vadd.f32 %v1724_v18, %v1301_v23 }
 0x23c   :  { %2204 = vst.msk [vmem:[%s4004_s4 + $0x138] sm:$0xff] %vm2165_vm1, %v2030_v17  ;;  %v2034_v21 = vadd.f32 %v2033_v19, %v1717_v14  ;;  %v1728_v22 = vpop.f32.mrf.mxu0 }
 0x23d   :  { %v2035_v24 = vpop.f32.mrf.mxu1  ;;  %v1729_v34 = vadd.f32 %v1728_v22, %v1306_v32  ;;  %v1336_v22 = vpop.permute.xlu0 %1335 }
 0x23e   :  { %2205 = vst [vmem:[%s4004_s4 + $0x140] sm:$0xff] %v2034_v21  ;;  %v2036_v26 = vadd.f32 %v2035_v24, %v1719_v20  ;;  %v1730_v27 = vpop.f32.mrf.mxu0 }
 0x23f   :  { %v2039_v28 = vpop.f32.mrf.mxu1  ;;  %v1731_v12 = vadd.f32 %v1730_v27, %v1306_v32 }
 0x240   :  { %2206 = vst.msk [vmem:[%s4004_s4 + $0x148] sm:$0xff] %vm2165_vm1, %v2036_v26  ;;  %v2040_v30 = vadd.f32 %v2039_v28, %v1723_v25  ;;  %v1734_v31 = vpop.f32.mrf.mxu0 }
 0x241   :  { %v2041_v33 = vpop.f32.mrf.mxu1  ;;  %v1735_v42 = vadd.f32 %v1734_v31, %v1311_v40  ;;  %v1341_v31 = vpop.permute.xlu1 %1340 }
 0x242   :  { %2207 = vst [vmem:[%s4004_s4 + $0x150] sm:$0xff] %v2040_v30  ;;  %v2042_v35 = vadd.f32 %v2041_v33, %v1725_v29  ;;  %v1736_v36 = vpop.f32.mrf.mxu0 }
 0x243   :  { %v2045_v60 = vpop.f32.mrf.mxu1  ;;  %v1737_v43 = vadd.f32 %v1736_v36, %v1311_v40 }
 0x244   :  { %2208 = vst.msk [vmem:[%s4004_s4 + $0x158] sm:$0xff] %vm2165_vm1, %v2042_v35  ;;  %v2046_v38 = vadd.f32 %v2045_v60, %v1729_v34  ;;  %v1740_v39 = vpop.f32.mrf.mxu0 }
 0x245   :  { %v2047_v41 = vpop.f32.mrf.mxu1  ;;  %v1741_v50 = vadd.f32 %v1740_v39, %v1316_v49  ;;  %v1346_v39 = vpop.permute.xlu0 %1345 }
 0x246   :  { %2209 = vst [vmem:[%s4004_s4 + $0x160] sm:$0xff] %v2046_v38  ;;  %v2048_v45 = vadd.f32 %v2047_v41, %v1731_v12  ;;  %v1742_v46 = vpop.f32.mrf.mxu0 }
 0x247   :  { %v2051_v37 = vpop.f32.mrf.mxu1  ;;  %v1743_v4 = vadd.f32 %v1742_v46, %v1316_v49 }
 0x248   :  { %2210 = vst.msk [vmem:[%s4004_s4 + $0x168] sm:$0xff] %vm2165_vm1, %v2048_v45  ;;  %v2052_v47 = vadd.f32 %v2051_v37, %v1735_v42  ;;  %v1746_v48 = vpop.f32.mrf.mxu0 }
 0x249   :  { %v2053_v44 = vpop.f32.mrf.mxu1  ;;  %v1747_v58 = vadd.f32 %v1746_v48, %v1321_v56  ;;  %v1351_v48 = vpop.permute.xlu1 %1350 }
 0x24a   :  { %2211 = vst [vmem:[%s4004_s4 + $0x170] sm:$0xff] %v2052_v47  ;;  %v2054_v51 = vadd.f32 %v2053_v44, %v1737_v43  ;;  %v1748_v52 = vpop.f32.mrf.mxu0 }
 0x24b   :  { %v2057_v53 = vpop.f32.mrf.mxu1  ;;  %v1749_v63 = vadd.f32 %v1748_v52, %v1321_v56 }
 0x24c   :  { %2212 = vst.msk [vmem:[%s4004_s4 + $0x178] sm:$0xff] %vm2165_vm1, %v2054_v51  ;;  %v2058_v54 = vadd.f32 %v2057_v53, %v1741_v50  ;;  %v1752_v55 = vpop.f32.mrf.mxu0 }
 0x24d   :  { %v2059_v57 = vpop.f32.mrf.mxu1  ;;  %v1753_v5 = vadd.f32 %v1752_v55, %v1326_v2  ;;  %v1356_v55 = vpop.permute.xlu0 %1355 }
 0x24e   :  { %2213 = vst [vmem:[%s4004_s4 + $0x180] sm:$0xff] %v2058_v54  ;;  %v2060_v59 = vadd.f32 %v2059_v57, %v1743_v4  ;;  %v1754_v61 = vpop.f32.mrf.mxu0 }
 0x24f   :  { %v2063_v62 = vpop.f32.mrf.mxu1  ;;  %v1755_v9 = vadd.f32 %v1754_v61, %v1326_v2 }
 0x250   :  { %2214 = vst.msk [vmem:[%s4004_s4 + $0x188] sm:$0xff] %vm2165_vm1, %v2060_v59  ;;  %v2064_v0 = vadd.f32 %v2063_v62, %v1747_v58  ;;  %v1758_v1 = vpop.f32.mrf.mxu0 }
 0x251   :  { %v2065_v3 = vpop.f32.mrf.mxu1  ;;  %v1759_v16 = vadd.f32 %v1758_v1, %v1331_v13  ;;  %v1361_v1 = vpop.permute.xlu1 %1360 }
 0x252   :  { %2215 = vst [vmem:[%s4004_s4 + $0x190] sm:$0xff] %v2064_v0  ;;  %v2066_v6 = vadd.f32 %v2065_v3, %v1749_v63  ;;  %v1760_v7 = vpop.f32.mrf.mxu0 }
 0x253   :  { %v2069_v8 = vpop.f32.mrf.mxu1  ;;  %v1761_v19 = vadd.f32 %v1760_v7, %v1331_v13 }
 0x254   :  { %2216 = vst.msk [vmem:[%s4004_s4 + $0x198] sm:$0xff] %vm2165_vm1, %v2066_v6  ;;  %v2070_v10 = vadd.f32 %v2069_v8, %v1753_v5  ;;  %v1764_v11 = vpop.f32.mrf.mxu0 }
 0x255   :  { %v2071_v15 = vpop.f32.mrf.mxu1  ;;  %v1765_v24 = vadd.f32 %v1764_v11, %v1336_v22  ;;  %v1366_v11 = vpop.permute.xlu0 %1365 }
 0x256   :  { %2217 = vst [vmem:[%s4004_s4 + $0x1a0] sm:$0xff] %v2070_v10  ;;  %v2072_v14 = vadd.f32 %v2071_v15, %v1755_v9  ;;  %v1766_v17 = vpop.f32.mrf.mxu0 }
 0x257   :  { %v2075_v18 = vpop.f32.mrf.mxu1  ;;  %v1767_v28 = vadd.f32 %v1766_v17, %v1336_v22 }
 0x258   :  { %2218 = vst.msk [vmem:[%s4004_s4 + $0x1a8] sm:$0xff] %vm2165_vm1, %v2072_v14  ;;  %v2076_v20 = vadd.f32 %v2075_v18, %v1759_v16  ;;  %v1770_v21 = vpop.f32.mrf.mxu0 }
 0x259   :  { %v2077_v23 = vpop.f32.mrf.mxu1  ;;  %v1771_v33 = vadd.f32 %v1770_v21, %v1341_v31  ;;  %v1371_v21 = vpop.permute.xlu1 %1370 }
 0x25a   :  { %2219 = vst [vmem:[%s4004_s4 + $0x1b0] sm:$0xff] %v2076_v20  ;;  %v2078_v25 = vadd.f32 %v2077_v23, %v1761_v19  ;;  %v1772_v26 = vpop.f32.mrf.mxu0 }
 0x25b   :  { %v2081_v27 = vpop.f32.mrf.mxu1  ;;  %v1773_v60 = vadd.f32 %v1772_v26, %v1341_v31 }
 0x25c   :  { %2220 = vst.msk [vmem:[%s4004_s4 + $0x1b8] sm:$0xff] %vm2165_vm1, %v2078_v25  ;;  %v2082_v29 = vadd.f32 %v2081_v27, %v1765_v24  ;;  %v1776_v30 = vpop.f32.mrf.mxu0 }
 0x25d   :  { %v2083_v32 = vpop.f32.mrf.mxu1  ;;  %v1777_v41 = vadd.f32 %v1776_v30, %v1346_v39  ;;  %v1376_v30 = vpop.permute.xlu0 %1375 }
 0x25e   :  { %2221 = vst [vmem:[%s4004_s4 + $0x1c0] sm:$0xff] %v2082_v29  ;;  %v2084_v34 = vadd.f32 %v2083_v32, %v1767_v28  ;;  %v1778_v35 = vpop.f32.mrf.mxu0 }
 0x25f   :  { %v2087_v36 = vpop.f32.mrf.mxu1  ;;  %v1779_v37 = vadd.f32 %v1778_v35, %v1346_v39 }
 0x260   :  { %2222 = vst.msk [vmem:[%s4004_s4 + $0x1c8] sm:$0xff] %vm2165_vm1, %v2084_v34  ;;  %v2088_v12 = vadd.f32 %v2087_v36, %v1771_v33  ;;  %v1782_v38 = vpop.f32.mrf.mxu0 }
 0x261   :  { %v2089_v40 = vpop.f32.mrf.mxu1  ;;  %v1783_v44 = vadd.f32 %v1782_v38, %v1351_v48  ;;  %v1381_v38 = vpop.permute.xlu1 %1380 }
 0x262   :  { %2223 = vst [vmem:[%s4004_s4 + $0x1d0] sm:$0xff] %v2088_v12  ;;  %v2090_v42 = vadd.f32 %v2089_v40, %v1773_v60  ;;  %v1784_v45 = vpop.f32.mrf.mxu0 }
 0x263   :  { %v2093_v46 = vpop.f32.mrf.mxu1  ;;  %v1785_v53 = vadd.f32 %v1784_v45, %v1351_v48 }
 0x264   :  { %2224 = vst.msk [vmem:[%s4004_s4 + $0x1d8] sm:$0xff] %vm2165_vm1, %v2090_v42  ;;  %v2094_v43 = vadd.f32 %v2093_v46, %v1777_v41  ;;  %v1788_v47 = vpop.f32.mrf.mxu0 }
 0x265   :  { %v2095_v49 = vpop.f32.mrf.mxu1  ;;  %v1789_v57 = vadd.f32 %v1788_v47, %v1356_v55  ;;  %v1386_v47 = vpop.permute.xlu0 %1385 }
 0x266   :  { %2225 = vst [vmem:[%s4004_s4 + $0x1e0] sm:$0xff] %v2094_v43  ;;  %v2096_v50 = vadd.f32 %v2095_v49, %v1779_v37  ;;  %v1790_v51 = vpop.f32.mrf.mxu0 }
 0x267   :  { %v2099_v52 = vpop.f32.mrf.mxu1  ;;  %v1791_v62 = vadd.f32 %v1790_v51, %v1356_v55 }
 0x268   :  { %2226 = vst.msk [vmem:[%s4004_s4 + $0x1e8] sm:$0xff] %vm2165_vm1, %v2096_v50  ;;  %v2100_v4 = vadd.f32 %v2099_v52, %v1783_v44  ;;  %v1794_v54 = vpop.f32.mrf.mxu0 }
 0x269   :  { %v2101_v56 = vpop.f32.mrf.mxu1  ;;  %v1795_v3 = vadd.f32 %v1794_v54, %v1361_v1  ;;  %v1391_v54 = vpop.permute.xlu1 %1390 }
 0x26a   :  { %2227 = vst [vmem:[%s4004_s4 + $0x1f0] sm:$0xff] %v2100_v4  ;;  %v2102_v58 = vadd.f32 %v2101_v56, %v1785_v53  ;;  %v1796_v59 = vpop.f32.mrf.mxu0 }
 0x26b   :  { %v2105_v61 = vpop.f32.mrf.mxu1  ;;  %v1797_v8 = vadd.f32 %v1796_v59, %v1361_v1 }
 0x26c   :  { %2228 = vst.msk [vmem:[%s4004_s4 + $0x1f8] sm:$0xff] %vm2165_vm1, %v2102_v58  ;;  %v2106_v63 = vadd.f32 %v2105_v61, %v1789_v57  ;;  %v1800_v0 = vpop.f32.mrf.mxu0  ;;  %v1396_v61 = vpop.permute.xlu0 %1395 }
 0x26d   :  { %v2107_v2 = vpop.f32.mrf.mxu1  ;;  %v1801_v15 = vadd.f32 %v1800_v0, %v1366_v11 }
 0x26e   :  { %2229 = vst [vmem:[%s4004_s4 + $0x200] sm:$0xff] %v2106_v63  ;;  %v2108_v5 = vadd.f32 %v2107_v2, %v1791_v62  ;;  %v1802_v6 = vpop.f32.mrf.mxu0 }
 0x26f   :  { %v2111_v7 = vpop.f32.mrf.mxu1  ;;  %v1803_v18 = vadd.f32 %v1802_v6, %v1366_v11  ;;  %v1401_v6 = vpop.permute.xlu1 %1400 }
 0x270   :  { %2230 = vst.msk [vmem:[%s4004_s4 + $0x208] sm:$0xff] %vm2165_vm1, %v2108_v5  ;;  %v2112_v9 = vadd.f32 %v2111_v7, %v1795_v3  ;;  %v1806_v10 = vpop.f32.mrf.mxu0 }
 0x271   :  { %v2113_v13 = vpop.f32.mrf.mxu1  ;;  %v1807_v23 = vadd.f32 %v1806_v10, %v1371_v21 }
 0x272   :  { %2231 = vst [vmem:[%s4004_s4 + $0x210] sm:$0xff] %v2112_v9  ;;  %v2114_v16 = vadd.f32 %v2113_v13, %v1797_v8  ;;  %v1808_v14 = vpop.f32.mrf.mxu0 }
 0x273   :  { %v2117_v17 = vpop.f32.mrf.mxu1  ;;  %v1809_v27 = vadd.f32 %v1808_v14, %v1371_v21 }
 0x274   :  { %2232 = vst.msk [vmem:[%s4004_s4 + $0x218] sm:$0xff] %vm2165_vm1, %v2114_v16  ;;  %v2118_v19 = vadd.f32 %v2117_v17, %v1801_v15  ;;  %v1812_v20 = vpop.f32.mrf.mxu0 }
 0x275   :  { %v2119_v22 = vpop.f32.mrf.mxu1  ;;  %v1813_v32 = vadd.f32 %v1812_v20, %v1376_v30 }
 0x276   :  { %2233 = vst [vmem:[%s4004_s4 + $0x220] sm:$0xff] %v2118_v19  ;;  %v2120_v24 = vadd.f32 %v2119_v22, %v1803_v18  ;;  %v1814_v25 = vpop.f32.mrf.mxu0 }
 0x277   :  { %v2123_v26 = vpop.f32.mrf.mxu1  ;;  %v1815_v36 = vadd.f32 %v1814_v25, %v1376_v30 }
 0x278   :  { %2234 = vst.msk [vmem:[%s4004_s4 + $0x228] sm:$0xff] %vm2165_vm1, %v2120_v24  ;;  %v2124_v28 = vadd.f32 %v2123_v26, %v1807_v23  ;;  %v1818_v29 = vpop.f32.mrf.mxu0 }
 0x279   :  { %v2125_v31 = vpop.f32.mrf.mxu1  ;;  %v1819_v40 = vadd.f32 %v1818_v29, %v1381_v38 }
 0x27a   :  { %2235 = vst [vmem:[%s4004_s4 + $0x230] sm:$0xff] %v2124_v28  ;;  %v2126_v33 = vadd.f32 %v2125_v31, %v1809_v27  ;;  %v1820_v34 = vpop.f32.mrf.mxu0 }
 0x27b   :  { %v2129_v35 = vpop.f32.mrf.mxu1  ;;  %v1821_v46 = vadd.f32 %v1820_v34, %v1381_v38 }
 0x27c   :  { %2236 = vst.msk [vmem:[%s4004_s4 + $0x238] sm:$0xff] %vm2165_vm1, %v2126_v33  ;;  %v2130_v60 = vadd.f32 %v2129_v35, %v1813_v32  ;;  %v1824_v12 = vpop.f32.mrf.mxu0 }
 0x27d   :  { %v2131_v39 = vpop.f32.mrf.mxu1  ;;  %v1825_v49 = vadd.f32 %v1824_v12, %v1386_v47 }
 0x27e   :  { %2237 = vst [vmem:[%s4004_s4 + $0x240] sm:$0xff] %v2130_v60  ;;  %v2132_v41 = vadd.f32 %v2131_v39, %v1815_v36  ;;  %v1826_v42 = vpop.f32.mrf.mxu0 }
 0x27f   :  { %v2135_v45 = vpop.f32.mrf.mxu1  ;;  %v1827_v52 = vadd.f32 %v1826_v42, %v1386_v47 }
 0x280   :  { %2238 = vst.msk [vmem:[%s4004_s4 + $0x248] sm:$0xff] %vm2165_vm1, %v2132_v41  ;;  %v2136_v37 = vadd.f32 %v2135_v45, %v1819_v40  ;;  %v1830_v43 = vpop.f32.mrf.mxu0 }
 0x281   :  { %v2137_v48 = vpop.f32.mrf.mxu1  ;;  %v1831_v56 = vadd.f32 %v1830_v43, %v1391_v54 }
 0x282   :  { %2239 = vst [vmem:[%s4004_s4 + $0x250] sm:$0xff] %v2136_v37  ;;  %v2138_v44 = vadd.f32 %v2137_v48, %v1821_v46  ;;  %v1832_v50 = vpop.f32.mrf.mxu0 }
 0x283   :  { %v2141_v51 = vpop.f32.mrf.mxu1  ;;  %v1833_v62 = vadd.f32 %v1832_v50, %v1391_v54 }
 0x284   :  { %2240 = vst.msk [vmem:[%s4004_s4 + $0x258] sm:$0xff] %vm2165_vm1, %v2138_v44  ;;  %v2142_v53 = vadd.f32 %v2141_v51, %v1825_v49  ;;  %v1836_v4 = vpop.f32.mrf.mxu0 }
 0x285   :  { %v2143_v55 = vpop.f32.mrf.mxu1  ;;  %v1837_v2 = vadd.f32 %v1836_v4, %v1396_v61 }
 0x286   :  { %2241 = vst [vmem:[%s4004_s4 + $0x260] sm:$0xff] %v2142_v53  ;;  %v2144_v57 = vadd.f32 %v2143_v55, %v1827_v52  ;;  %v1838_v58 = vpop.f32.mrf.mxu0 }
 0x287   :  { %v2147_v59 = vpop.f32.mrf.mxu1  ;;  %v1839_v7 = vadd.f32 %v1838_v58, %v1396_v61 }
 0x288   :  { %2242 = vst.msk [vmem:[%s4004_s4 + $0x268] sm:$0xff] %vm2165_vm1, %v2144_v57  ;;  %v2148_v63 = vadd.f32 %v2147_v59, %v1831_v56  ;;  %v1842_v0 = vpop.f32.mrf.mxu0 }
 0x289   :  { %v2149_v1 = vpop.f32.mrf.mxu1  ;;  %v1843_v11 = vadd.f32 %v1842_v0, %v1401_v6 }
 0x28a   :  { %2243 = vst [vmem:[%s4004_s4 + $0x270] sm:$0xff] %v2148_v63  ;;  %v2150_v3 = vadd.f32 %v2149_v1, %v1833_v62  ;;  %v1844_v9 = vpop.f32.mrf.mxu0 }
 0x28b   :  { %v2153_v5 = vpop.f32.mrf.mxu1  ;;  %v1845_v16 = vadd.f32 %v1844_v9, %v1401_v6 }
 0x28c   :  { %2244 = vst.msk [vmem:[%s4004_s4 + $0x278] sm:$0xff] %vm2165_vm1, %v2150_v3  ;;  %v2154_v8 = vadd.f32 %v2153_v5, %v1837_v2 }
 0x28d   :  { %v2155_v10 = vpop.f32.mrf.mxu1 }
 0x28e   :  { %2245 = vst [vmem:[%s4004_s4 + $0x280] sm:$0xff] %v2154_v8  ;;  %v2156_v13 = vadd.f32 %v2155_v10, %v1839_v7 }
 0x28f   :  { %v2159_v15 = vpop.f32.mrf.mxu1 }
 0x290   :  { %2246 = vst.msk [vmem:[%s4004_s4 + $0x288] sm:$0xff] %vm2165_vm1, %v2156_v13  ;;  %v2160_v14 = vadd.f32 %v2159_v15, %v1843_v11 }
 0x291   :  { %v2161_v17 = vpop.f32.mrf.mxu1 }
 0x292   :  { %2247 = vst [vmem:[%s4004_s4 + $0x290] sm:$0xff] %v2160_v14  ;;  %v2162_v18 = vadd.f32 %v2161_v17, %v1845_v16 }
 0x294   :  { %2248 = vst.msk [vmem:[%s4004_s4 + $0x298] sm:$0xff] %vm2165_vm1, %v2162_v18 }

</bundles_post_ra>
